<compile_context>
chip_gen: v5e
topology: v5e:2x2
jax: 0.10.0
libtpu: 0.0.40
codegen_flags: <defaults>
</compile_context>

<pallas_src>
import math
import functools

import jax
import jax.numpy as jnp
from jax import lax
from jax.experimental import pallas as pl
from jax.experimental.pallas import tpu as pltpu


_MASK_VALUE = -1e30


# --------------------------------------------------------------------------
# small math helpers
# --------------------------------------------------------------------------
def _rmsnorm(x, g, eps):
    ms = jnp.mean(x * x, axis=-1, keepdims=True)
    return x * lax.rsqrt(ms + eps) * g


def _gelu_exact(x):
    return 0.5 * x * (1.0 + lax.erf(x * (1.0 / math.sqrt(2.0))))


def _gelu_tanh(x):
    # tanh-approx GELU: the transcendental goes to the EUP slot instead of
    # burning ~15-20 VPU ops/element (use when tolerance allows).
    c = math.sqrt(2.0 / math.pi)
    return 0.5 * x * (1.0 + jnp.tanh(c * (x + 0.044715 * x * x * x)))


# --------------------------------------------------------------------------
# capability probes / budgets
# --------------------------------------------------------------------------
@functools.lru_cache(maxsize=1)
def _single_buffering_supported():
    """Probe once whether pipeline_mode=pl.Buffered(1) works on this JAX/TPU."""
    def probe(x_ref, o_ref):
        o_ref[...] = x_ref[...] + 1.0

    try:
        with jax.ensure_compile_time_eval():
            spec = pl.BlockSpec((8, 128), lambda i: (0, 0),
                                pipeline_mode=pl.Buffered(1))
            out = pl.pallas_call(
                probe,
                out_shape=jax.ShapeDtypeStruct((8, 128), jnp.float32),
                grid=(2,),
                in_specs=[spec],
                out_specs=pl.BlockSpec((8, 128), lambda i: (0, 0)),
            )(jnp.zeros((8, 128), jnp.float32))
            jax.block_until_ready(out)
        return True
    except Exception:
        return False


def _const_block_spec(block_shape, index_map):
    """BlockSpec for grid-invariant inputs: single-buffered when supported
    (the second pipeline buffer for a constant-index block is dead weight)."""
    if _single_buffering_supported():
        return pl.BlockSpec(block_shape, index_map,
                            pipeline_mode=pl.Buffered(1))
    return pl.BlockSpec(block_shape, index_map)


def _vmem_limit_bytes():
    """Per-generation VMEM budget (v7x: 64 MiB physical -> stay <= 40 MiB;
    v5e/v6e: 128 MiB physical -> allow ~96 MiB).  None -> compiler default."""
    try:
        cap = int(pltpu.get_tpu_info().vmem_capacity_bytes)
    except Exception:
        return None
    if cap <= 64 * 1024 * 1024:
        return 40 * 1024 * 1024
    return 96 * 1024 * 1024


def _pick_tile(n, target, quanta):
    """Largest divisor of n that is <= target and a multiple of a preferred
    quantum (tried in order); falls back to the full dimension (always legal
    for the Mosaic block-shape constraint)."""
    if n <= target:
        return n
    for q in quanta:
        t = (target // q) * q
        while t >= q:
            if t <= n and n % t == 0:
                return t
            t -= q
    return n


# --------------------------------------------------------------------------
# Kernel A: RMSNorm1 + causal MHSA + residual 1 + RMSNorm2
# --------------------------------------------------------------------------
def attention_kernel(x_ref, g1_ref, g2_ref, wqkv_ref, wo_ref,    # inputs
                     y1_ref, y2_ref,                             # outputs
                     k_s, v_s, m_s, l_s, acc_s,                  # scratch
                     *, num_heads, eps, tq, compute_dtype):
    f32 = jnp.float32
    cd = compute_dtype
    D = x_ref.shape[-1]
    H = num_heads
    hd = D // H
    qi = pl.program_id(1)

    # ---- per-tile fused QKV projection (no full-sequence intermediate) ----
    xf = x_ref[0].astype(f32)                                         # (tq, D)
    xn = _rmsnorm(xf, g1_ref[...].astype(f32), eps).astype(cd)
    qkv = jnp.dot(xn, wqkv_ref[...], preferred_element_type=f32)      # (tq, 3D)

    def to_heads(z):                       # (tq, D) -> (H, tq, hd), one transpose
        return z.astype(cd).reshape(tq, H, hd).transpose(1, 0, 2)

    q_h = to_heads(qkv[:, :D])             # 1/sqrt(hd) already folded into Wqkv
    k_h = to_heads(qkv[:, D:2 * D])
    v_h = to_heads(qkv[:, 2 * D:])

    # append this tile's K/V to the per-batch cache (carried across qi)
    k_s[qi] = k_h
    v_s[qi] = v_h

    # ---- causal flash attention over kv tiles 0..qi ----
    # Diagonal tile first: the only tile needing the causal mask, and it
    # initializes the online-softmax state (so no -inf init pass).
    s = jnp.einsum("hqd,hkd->hqk", q_h, k_h, preferred_element_type=f32)
    r = lax.broadcasted_iota(jnp.int32, (tq, tq), 0)
    c = lax.broadcasted_iota(jnp.int32, (tq, tq), 1)
    s = jnp.where((c <= r)[None, :, :], s, _MASK_VALUE)
    m0 = jnp.max(s, axis=-1, keepdims=True)                           # (H, tq, 1)
    p0 = jnp.exp(s - m0)
    m_s[...] = m0
    l_s[...] = jnp.sum(p0, axis=-1, keepdims=True)
    acc_s[...] = jnp.einsum("hqk,hkd->hqd", p0.astype(cd), v_h,
                            preferred_element_type=f32)

    # Strictly-below-diagonal kv tiles: never masked, never skipped columns.
    @pl.loop(0, qi)
    def _(j):
        sj = jnp.einsum("hqd,hkd->hqk", q_h, k_s[j],
                        preferred_element_type=f32)                   # (H, tq, tq)
        m_prev = m_s[...]
        m_new = jnp.maximum(m_prev, jnp.max(sj, axis=-1, keepdims=True))
        alpha = jnp.exp(m_prev - m_new)
        pj = jnp.exp(sj - m_new)
        l_s[...] = alpha * l_s[...] + jnp.sum(pj, axis=-1, keepdims=True)
        acc_s[...] = alpha * acc_s[...] + jnp.einsum(
            "hqk,hkd->hqd", pj.astype(cd), v_s[j], preferred_element_type=f32)
        m_s[...] = m_new

    # ---- merge heads -> single full-depth output projection ----
    ctx = acc_s[...] * pl.reciprocal(l_s[...], approx=True)           # (H, tq, hd)
    ctx = ctx.transpose(1, 0, 2).reshape(tq, D).astype(cd)            # (tq, H*hd)
    attn = jnp.dot(ctx, wo_ref[...], preferred_element_type=f32)      # (tq, D)

    # TODO(synk): attn_pdrop / residual_pdrop are eval-mode identities here;
    # training-mode dropout would need pltpu.prng_* random bits.
    y1 = xf + attn                                                    # residual 1
    y1_ref[0] = y1.astype(y1_ref.dtype)
    y2_ref[0] = _rmsnorm(y1, g2_ref[...].astype(f32), eps).astype(y2_ref.dtype)


# --------------------------------------------------------------------------
# Kernel B: FFN (GELU MLP) + residual 2, rows flattened over (B, S)
# --------------------------------------------------------------------------
def ffn_kernel(y2_ref, y1_ref, w1_ref, w2_ref, o_ref, acc_s, *, approx_gelu):
    f32 = jnp.float32
    fi = pl.program_id(1)

    @pl.when(fi == 0)
    def _init():
        acc_s[...] = jnp.zeros_like(acc_s)

    h = jnp.dot(y2_ref[...], w1_ref[...], preferred_element_type=f32)  # (tm, tff)
    h = (_gelu_tanh(h) if approx_gelu else _gelu_exact(h)).astype(y2_ref.dtype)
    acc_s[...] += jnp.dot(h, w2_ref[...], preferred_element_type=f32)

    @pl.when(fi == pl.num_programs(1) - 1)
    def _finalize():
        o_ref[...] = (acc_s[...] + y1_ref[...].astype(f32)).astype(o_ref.dtype)


# --------------------------------------------------------------------------
# wrappers
# --------------------------------------------------------------------------
def prepare_params(params, *, num_heads, compute_dtype=jnp.bfloat16):
    """One-time weight plumbing (do NOT redo per forward call): [out,in] ->
    [in,out] transposes, fused Q/K/V with the 1/sqrt(hd) scale folded into the
    Q columns, compute-dtype casts."""
    D = params["wq"].shape[0]
    hd = D // num_heads
    scale = 1.0 / math.sqrt(hd)
    cd = compute_dtype
    return {
        "wqkv": jnp.concatenate(
            [params["wq"].T * scale, params["wk"].T, params["wv"].T],
            axis=1).astype(cd),                              # (D, 3D)
        "wo": params["wo"].T.astype(cd),                     # (D, D)
        "w1": params["w1"].T.astype(cd),                     # (D, d_ff)
        "w2": params["w2"].T.astype(cd),                     # (d_ff, D)
        "g1": params["ln1"].reshape(1, D).astype(jnp.float32),
        "g2": params["ln2"].reshape(1, D).astype(jnp.float32),
    }


def transformer_block(x, prep, *, num_heads, eps=1e-5, tq=None, tm=None,
                      tff=None, compute_dtype=jnp.bfloat16, approx_gelu=False):
    B, S, D = x.shape
    d_ff = prep["w1"].shape[1]
    assert D % num_heads == 0
    hd = D // num_heads
    cd = compute_dtype

    if tq is None:
        tq = _pick_tile(S, 256, (128, 16, 8))        # query tile (MXU M dim)
    if tff is None:
        tff = _pick_tile(d_ff, 1024, (256, 128))     # d_ff chunk
    R = B * S
    if tm is None:
        tm = _pick_tile(R, 512, (128, 16, 8))        # FFN row tile (>= tq)
    assert S % tq == 0 and d_ff % tff == 0 and R % tm == 0
    assert tq == S or tq % 8 == 0
    assert tm == R or tm % 8 == 0
    assert tff == d_ff or tff % 128 == 0
    nq, nff = S // tq, d_ff // tff

    vmem_limit = _vmem_limit_bytes()

    # ---------------- attention + residual 1 + RMSNorm2 ----------------
    attn = functools.partial(attention_kernel, num_heads=num_heads, eps=eps,
                             tq=tq, compute_dtype=cd)
    y1, y2 = pl.pallas_call(
        attn,
        out_shape=(jax.ShapeDtypeStruct((B, S, D), jnp.float32),   # y1 residual
                   jax.ShapeDtypeStruct((B, S, D), cd)),           # RMSNorm2(y1)
        grid=(B, nq),
        in_specs=[
            pl.BlockSpec((1, tq, D), lambda b, q: (b, q, 0)),         # x tile
            _const_block_spec((1, D), lambda b, q: (0, 0)),           # ln1 gain
            _const_block_spec((1, D), lambda b, q: (0, 0)),           # ln2 gain
            _const_block_spec((D, 3 * D), lambda b, q: (0, 0)),       # Wqkv
            _const_block_spec((D, D), lambda b, q: (0, 0)),           # Wo
        ],
        out_specs=(
            pl.BlockSpec((1, tq, D), lambda b, q: (b, q, 0)),
            pl.BlockSpec((1, tq, D), lambda b, q: (b, q, 0)),
        ),
        scratch_shapes=[
            pltpu.VMEM((nq, num_heads, tq, hd), cd),        # K cache (prefix)
            pltpu.VMEM((nq, num_heads, tq, hd), cd),        # V cache (prefix)
            pltpu.VMEM((num_heads, tq, 1), jnp.float32),    # online-softmax m
            pltpu.VMEM((num_heads, tq, 1), jnp.float32),    # online-softmax l
            pltpu.VMEM((num_heads, tq, hd), jnp.float32),   # context accum
        ],
        compiler_params=pltpu.CompilerParams(
            # b: independent -> megacore-parallel; q: carries the K/V prefix
            # cache -> must stay sequential.
            dimension_semantics=("parallel", "arbitrary"),
            vmem_limit_bytes=vmem_limit),
    )(x, prep["g1"], prep["g2"], prep["wqkv"], prep["wo"])

    # ---------------- FFN + residual 2 (rows flattened over B*S) ----------
    ffn = functools.partial(ffn_kernel, approx_gelu=approx_gelu)
    out = pl.pallas_call(
        ffn,
        out_shape=jax.ShapeDtypeStruct((R, D), x.dtype),
        grid=(R // tm, nff),
        in_specs=[
            pl.BlockSpec((tm, D), lambda r, f: (r, 0)),    # y2 rows
            pl.BlockSpec((tm, D), lambda r, f: (r, 0)),    # y1 rows (residual)
            pl.BlockSpec((D, tff), lambda r, f: (0, f)),   # W1 chunk
            pl.BlockSpec((tff, D), lambda r, f: (f, 0)),   # W2 chunk
        ],
        out_specs=pl.BlockSpec((tm, D), lambda r, f: (r, 0)),
        scratch_shapes=[pltpu.VMEM((tm, D), jnp.float32)],
        compiler_params=pltpu.CompilerParams(
            # rows: independent -> parallel (keeps both v7x TCs busy at B=1);
            # d_ff chunks carry the accumulator -> sequential.
            dimension_semantics=("parallel", "arbitrary"),
            vmem_limit_bytes=vmem_limit),
    )(y2.reshape(R, D), y1.reshape(R, D), prep["w1"], prep["w2"])

    return out.reshape(B, S, D)


# ---------------- pure-JAX reference (mirrors the kernel's mixed precision) --
def reference_block(x, params, *, num_heads, eps=1e-5,
                    compute_dtype=jnp.bfloat16):
    B, S, D = x.shape
    hd = D // num_heads
    cd = compute_dtype
    f32 = jnp.float32

    def rms(z, g):
        return z * lax.rsqrt(jnp.mean(z * z, -1, keepdims=True) + eps) * g

    def mm(a, w_t):  # a: (..., in) activations, w_t: (in, out) pre-cast weight
        return jnp.dot(a.astype(cd), w_t, preferred_element_type=f32)

    scale = 1.0 / math.sqrt(hd)
    wq_t = (params["wq"].T * scale).astype(cd)
    wk_t = params["wk"].T.astype(cd)
    wv_t = params["wv"].T.astype(cd)
    wo_t = params["wo"].T.astype(cd)
    w1_t = params["w1"].T.astype(cd)
    w2_t = params["w2"].T.astype(cd)

    y = rms(x, params["ln1"])
    q = mm(y, wq_t).reshape(B, S, num_heads, hd)
    k = mm(y, wk_t).reshape(B, S, num_heads, hd).astype(cd)
    v = mm(y, wv_t).reshape(B, S, num_heads, hd).astype(cd)
    scores = jnp.einsum("bqhd,bkhd->bhqk", q.astype(cd), k,
                        preferred_element_type=f32)
    mask = jnp.tril(jnp.ones((S, S), dtype=bool))
    scores = jnp.where(mask, scores, _MASK_VALUE)
    p = jax.nn.softmax(scores, axis=-1)
    ctx = jnp.einsum("bhqk,bkhd->bqhd", p.astype(cd), v,
                     preferred_element_type=f32).reshape(B, S, D)
    y1 = x + mm(ctx, wo_t)
    y2 = rms(y1, params["ln2"])
    h1 = _gelu_exact(mm(y2, w1_t))
    return mm(h1, w2_t) + y1


if __name__ == "__main__":
    B, S, D, H, DFF = 2, 32, 64, 4, 256
    key = jax.random.PRNGKey(0)
    ks = jax.random.split(key, 9)

    def init(k, shape, s):
        return jax.random.normal(k, shape, jnp.float32) * s

    params = {
        "ln1": 1.0 + 0.01 * jax.random.normal(ks[0], (D,), jnp.float32),
        "ln2": 1.0 + 0.01 * jax.random.normal(ks[1], (D,), jnp.float32),
        "wq": init(ks[2], (D, D), 1.0 / math.sqrt(D)),
        "wk": init(ks[3], (D, D), 1.0 / math.sqrt(D)),
        "wv": init(ks[4], (D, D), 1.0 / math.sqrt(D)),
        "wo": init(ks[5], (D, D), 1.0 / math.sqrt(D)),
        "w1": init(ks[6], (DFF, D), 1.0 / math.sqrt(D)),
        "w2": init(ks[7], (D, DFF), 1.0 / math.sqrt(DFF)),
    }
    x = jax.random.normal(ks[8], (B, S, D), jnp.float32)

    # One-time weight plumbing (feedback: don't redo the concat/transpose/cast
    # on every forward call).
    prep = jax.block_until_ready(prepare_params(params, num_heads=H))

    # tq=16 -> 2 query tiles per batch element (exercises the causal kv-tile
    # loop + diagonal-tile path); tm=32, tff=128 -> 2x2 FFN grid (exercises the
    # d_ff accumulator).
    out = transformer_block(x, prep, num_heads=H, tq=16, tm=32, tff=128)
    out = jax.block_until_ready(out)

    ref = reference_block(x, params, num_heads=H)
    assert out.shape == (B, S, D)
    assert out.dtype == x.dtype
    err = float(jnp.max(jnp.abs(out - ref)))
    assert jnp.allclose(out, ref, atol=2e-2, rtol=2e-2), (
        f"mismatch vs reference (max abs err {err})")
    print("KERNEL_OK")
</pallas_src>

<mosaic_0001>
module attributes {stable_mosaic.version = 11 : i64} {
  func.func @probe(%arg0: i32, %arg1: memref<8x128xf32, #tpu.memory_space<vmem>>, %arg2: memref<8x128xf32, #tpu.memory_space<vmem>>) attributes {dimension_semantics = [#tpu.dimension_semantics<arbitrary>], iteration_bounds = array<i64: 2>, scalar_prefetch = 0 : i64, scratch_operands = 0 : i64, tpu.core_type = #tpu.core_type<tc>, window_params = [{pipeline_mode = #tpu.pipeline_mode<synchronous>, transform_indices = @transform_0, window_bounds = array<i64: 8, 128>}, {pipeline_mode = #tpu.pipeline_mode<synchronous>, transform_indices = @transform_1, window_bounds = array<i64: 8, 128>}]} {
    %c0 = arith.constant 0 : index
    %c0_0 = arith.constant 0 : index
    %0 = vector.load %arg1[%c0, %c0_0] : memref<8x128xf32, #tpu.memory_space<vmem>>, vector<8x128xf32>
    %cst = arith.constant 1.000000e+00 : f32
    %1 = vector.broadcast %cst : f32 to vector<8x128xf32>
    %2 = arith.addf %0, %1 : vector<8x128xf32>
    %c0_1 = arith.constant 0 : index
    %c0_2 = arith.constant 0 : index
    %3 = vector.load %arg2[%c0_1, %c0_2] : memref<8x128xf32, #tpu.memory_space<vmem>>, vector<8x128xf32>
    tpu.vector_store %arg2[%c0_1, %c0_2], %2 {strides = array<i32>} : memref<8x128xf32, #tpu.memory_space<vmem>>, vector<8x128xf32>,
    return
  }
  func.func @transform_0(%arg0: i32) -> (i32, i32) {
    %c0_i32 = arith.constant 0 : i32
    %c0_i32_0 = arith.constant 0 : i32
    %c0_i32_1 = arith.constant 0 : i32
    return %c0_i32, %c0_i32_0 : i32, i32
  }
  func.func @transform_1(%arg0: i32) -> (i32, i32) {
    %c0_i32 = arith.constant 0 : i32
    %c0_i32_0 = arith.constant 0 : i32
    %c0_i32_1 = arith.constant 0 : i32
    return %c0_i32, %c0_i32_0 : i32, i32
  }
}

module attributes {stable_mosaic.version = 11 : i64} {
  func.func @attention_kernel(%arg0: i32, %arg1: i32, %arg2: memref<1x16x64xf32, #tpu.memory_space<vmem>>, %arg3: memref<1x64xf32, #tpu.memory_space<vmem>>, %arg4: memref<1x64xf32, #tpu.memory_space<vmem>>, %arg5: memref<64x192xbf16, #tpu.memory_space<vmem>>, %arg6: memref<64x64xbf16, #tpu.memory_space<vmem>>, %arg7: memref<1x16x64xf32, #tpu.memory_space<vmem>>, %arg8: memref<1x16x64xbf16, #tpu.memory_space<vmem>>, %arg9: memref<2x4x16x16xbf16, #tpu.memory_space<vmem>>, %arg10: memref<2x4x16x16xbf16, #tpu.memory_space<vmem>>, %arg11: memref<4x16x1xf32, #tpu.memory_space<vmem>>, %arg12: memref<4x16x1xf32, #tpu.memory_space<vmem>>, %arg13: memref<4x16x16xf32, #tpu.memory_space<vmem>>) attributes {dimension_semantics = [#tpu.dimension_semantics<parallel>, #tpu.dimension_semantics<arbitrary>], iteration_bounds = array<i64: 2, 2>, scalar_prefetch = 0 : i64, scratch_operands = 5 : i64, tpu.core_type = #tpu.core_type<tc>, window_params = [{transform_indices = @transform_0, window_bounds = array<i64: 1, 16, 64>}, {pipeline_mode = #tpu.pipeline_mode<synchronous>, transform_indices = @transform_1, window_bounds = array<i64: 1, 64>}, {pipeline_mode = #tpu.pipeline_mode<synchronous>, transform_indices = @transform_2, window_bounds = array<i64: 1, 64>}, {pipeline_mode = #tpu.pipeline_mode<synchronous>, transform_indices = @transform_3, window_bounds = array<i64: 64, 192>}, {pipeline_mode = #tpu.pipeline_mode<synchronous>, transform_indices = @transform_4, window_bounds = array<i64: 64, 64>}, {transform_indices = @transform_5, window_bounds = array<i64: 1, 16, 64>}, {transform_indices = @transform_6, window_bounds = array<i64: 1, 16, 64>}]} {
    %c0 = arith.constant 0 : index
    %c0_0 = arith.constant 0 : index
    %c0_1 = arith.constant 0 : index
    %0 = vector.load %arg2[%c0, %c0_0, %c0_1] : memref<1x16x64xf32, #tpu.memory_space<vmem>>, vector<1x16x64xf32>
    %1 = vector.shape_cast %0 : vector<1x16x64xf32> to vector<16x64xf32>
    %c0_2 = arith.constant 0 : index
    %c0_3 = arith.constant 0 : index
    %2 = vector.load %arg3[%c0_2, %c0_3] : memref<1x64xf32, #tpu.memory_space<vmem>>, vector<1x64xf32>
    %3 = arith.mulf %1, %1 : vector<16x64xf32>
    %cst = arith.constant dense<0.000000e+00> : vector<16xf32>
    %4 = vector.multi_reduction <add>, %3, %cst [1] : vector<16x64xf32> to vector<16xf32>
    %5 = vector.shape_cast %4 : vector<16xf32> to vector<16x1xf32>
    %cst_4 = arith.constant 6.400000e+01 : f32
    %6 = vector.broadcast %cst_4 : f32 to vector<16x1xf32>
    %7 = arith.divf %5, %6 : vector<16x1xf32>
    %cst_5 = arith.constant 9.99999974E-6 : f32
    %8 = vector.broadcast %cst_5 : f32 to vector<16x1xf32>
    %9 = arith.addf %7, %8 : vector<16x1xf32>
    %10 = math.rsqrt %9 : vector<16x1xf32>
    %11 = vector.broadcast %10 : vector<16x1xf32> to vector<16x64xf32>
    %12 = arith.mulf %1, %11 : vector<16x64xf32>
    %13 = vector.broadcast %2 : vector<1x64xf32> to vector<16x64xf32>
    %14 = arith.mulf %12, %13 : vector<16x64xf32>
    %15 = arith.truncf %14 : vector<16x64xf32> to vector<16x64xbf16>
    %c0_6 = arith.constant 0 : index
    %c0_7 = arith.constant 0 : index
    %16 = vector.load %arg5[%c0_6, %c0_7] : memref<64x192xbf16, #tpu.memory_space<vmem>>, vector<64x192xbf16>
    %cst_8 = arith.constant dense<0.000000e+00> : vector<16x192xf32>
    %17 = tpu.matmul %15, %16, %cst_8 {dimension_numbers = #tpu.dot_dimension_numbers<[1], [0], [0], [1], [0, 0, 1, 1], [], []>} : vector<16x64xbf16>, vector<64x192xbf16>, vector<16x192xf32> -> vector<16x192xf32>
    %18 = vector.extract_strided_slice %17 {offsets = [0, 0], sizes = [16, 64], strides = [1, 1]} : vector<16x192xf32> to vector<16x64xf32>
    %19 = arith.truncf %18 : vector<16x64xf32> to vector<16x64xbf16>
    %20 = vector.shape_cast %19 : vector<16x64xbf16> to vector<16x4x16xbf16>
    %21 = tpu.transpose %20, [1, 0, 2] : vector<16x4x16xbf16> -> vector<4x16x16xbf16>
    %22 = vector.extract_strided_slice %17 {offsets = [0, 64], sizes = [16, 64], strides = [1, 1]} : vector<16x192xf32> to vector<16x64xf32>
    %23 = arith.truncf %22 : vector<16x64xf32> to vector<16x64xbf16>
    %24 = vector.shape_cast %23 : vector<16x64xbf16> to vector<16x4x16xbf16>
    %25 = tpu.transpose %24, [1, 0, 2] : vector<16x4x16xbf16> -> vector<4x16x16xbf16>
    %26 = vector.extract_strided_slice %17 {offsets = [0, 128], sizes = [16, 64], strides = [1, 1]} : vector<16x192xf32> to vector<16x64xf32>
    %27 = arith.truncf %26 : vector<16x64xf32> to vector<16x64xbf16>
    %28 = vector.shape_cast %27 : vector<16x64xbf16> to vector<16x4x16xbf16>
    %29 = tpu.transpose %28, [1, 0, 2] : vector<16x4x16xbf16> -> vector<4x16x16xbf16>
    %30 = arith.index_cast %arg1 : i32 to index
    %c0_9 = arith.constant 0 : index
    %c0_10 = arith.constant 0 : index
    %c0_11 = arith.constant 0 : index
    %31 = vector.load %arg9[%30, %c0_9, %c0_10, %c0_11] : memref<2x4x16x16xbf16, #tpu.memory_space<vmem>>, vector<1x4x16x16xbf16>
    %32 = vector.shape_cast %31 : vector<1x4x16x16xbf16> to vector<4x16x16xbf16>
    %33 = vector.shape_cast %25 : vector<4x16x16xbf16> to vector<1x4x16x16xbf16>
    tpu.vector_store %arg9[%30, %c0_9, %c0_10, %c0_11], %33 {strides = array<i32>} : memref<2x4x16x16xbf16, #tpu.memory_space<vmem>>, vector<1x4x16x16xbf16>,
    %34 = arith.index_cast %arg1 : i32 to index
    %c0_12 = arith.constant 0 : index
    %c0_13 = arith.constant 0 : index
    %c0_14 = arith.constant 0 : index
    %35 = vector.load %arg10[%34, %c0_12, %c0_13, %c0_14] : memref<2x4x16x16xbf16, #tpu.memory_space<vmem>>, vector<1x4x16x16xbf16>
    %36 = vector.shape_cast %35 : vector<1x4x16x16xbf16> to vector<4x16x16xbf16>
    %37 = vector.shape_cast %29 : vector<4x16x16xbf16> to vector<1x4x16x16xbf16>
    tpu.vector_store %arg10[%34, %c0_12, %c0_13, %c0_14], %37 {strides = array<i32>} : memref<2x4x16x16xbf16, #tpu.memory_space<vmem>>, vector<1x4x16x16xbf16>,
    "tpu.trace_start"() <{level = 10 : i32, message = "hqd,hkd->hqk"}> : () -> ()
    %cst_15 = arith.constant dense<0.000000e+00> : vector<4x16x16xf32>
    %38 = tpu.matmul %21, %25, %cst_15 {dimension_numbers = #tpu.dot_dimension_numbers<[2], [2], [1], [1], [0, 0, 0, 1, 1, 1], [0], [0]>} : vector<4x16x16xbf16>, vector<4x16x16xbf16>, vector<4x16x16xf32> -> vector<4x16x16xf32>
    "tpu.trace_stop"() : () -> ()
    %39 = tpu.iota {dimensions = array<i32: 0>} : vector<16x16xi32>
    %40 = tpu.iota {dimensions = array<i32: 1>} : vector<16x16xi32>
    %41 = arith.cmpi sle, %40, %39 : vector<16x16xi32>
    %42 = vector.shape_cast %41 : vector<16x16xi1> to vector<1x16x16xi1>
    %cst_16 = arith.constant -1.000000e+30 : f32
    %43 = vector.shape_cast %42 : vector<1x16x16xi1> to vector<1x16x16xi1>
    %44 = vector.broadcast %43 : vector<1x16x16xi1> to vector<4x16x16xi1>
    %45 = vector.broadcast %cst_16 : f32 to vector<4x16x16xf32>
    %46 = arith.select %44, %38, %45 : vector<4x16x16xi1>, vector<4x16x16xf32>
    %cst_17 = arith.constant dense<0xFF800000> : vector<4x16xf32>
    %47 = vector.multi_reduction <maximumf>, %46, %cst_17 [2] : vector<4x16x16xf32> to vector<4x16xf32>
    %48 = vector.shape_cast %47 : vector<4x16xf32> to vector<4x16x1xf32>
    %49 = vector.broadcast %48 : vector<4x16x1xf32> to vector<4x16x16xf32>
    %50 = arith.subf %46, %49 : vector<4x16x16xf32>
    %51 = math.exp %50 : vector<4x16x16xf32>
    %c0_18 = arith.constant 0 : index
    %c0_19 = arith.constant 0 : index
    %c0_20 = arith.constant 0 : index
    %52 = vector.load %arg11[%c0_18, %c0_19, %c0_20] : memref<4x16x1xf32, #tpu.memory_space<vmem>>, vector<4x16x1xf32>
    tpu.vector_store %arg11[%c0_18, %c0_19, %c0_20], %48 {strides = array<i32>} : memref<4x16x1xf32, #tpu.memory_space<vmem>>, vector<4x16x1xf32>,
    %cst_21 = arith.constant dense<0.000000e+00> : vector<4x16xf32>
    %53 = vector.multi_reduction <add>, %51, %cst_21 [2] : vector<4x16x16xf32> to vector<4x16xf32>
    %54 = vector.shape_cast %53 : vector<4x16xf32> to vector<4x16x1xf32>
    %c0_22 = arith.constant 0 : index
    %c0_23 = arith.constant 0 : index
    %c0_24 = arith.constant 0 : index
    %55 = vector.load %arg12[%c0_22, %c0_23, %c0_24] : memref<4x16x1xf32, #tpu.memory_space<vmem>>, vector<4x16x1xf32>
    tpu.vector_store %arg12[%c0_22, %c0_23, %c0_24], %54 {strides = array<i32>} : memref<4x16x1xf32, #tpu.memory_space<vmem>>, vector<4x16x1xf32>,
    %56 = arith.truncf %51 : vector<4x16x16xf32> to vector<4x16x16xbf16>
    "tpu.trace_start"() <{level = 10 : i32, message = "hqk,hkd->hqd"}> : () -> ()
    %cst_25 = arith.constant dense<0.000000e+00> : vector<4x16x16xf32>
    %57 = tpu.matmul %56, %29, %cst_25 {dimension_numbers = #tpu.dot_dimension_numbers<[2], [1], [1], [2], [0, 0, 0, 1, 1, 2], [0], [0]>} : vector<4x16x16xbf16>, vector<4x16x16xbf16>, vector<4x16x16xf32> -> vector<4x16x16xf32>
    "tpu.trace_stop"() : () -> ()
    %c0_26 = arith.constant 0 : index
    %c0_27 = arith.constant 0 : index
    %c0_28 = arith.constant 0 : index
    %58 = vector.load %arg13[%c0_26, %c0_27, %c0_28] : memref<4x16x16xf32, #tpu.memory_space<vmem>>, vector<4x16x16xf32>
    tpu.vector_store %arg13[%c0_26, %c0_27, %c0_28], %57 {strides = array<i32>} : memref<4x16x16xf32, #tpu.memory_space<vmem>>, vector<4x16x16xf32>,
    %c0_i32 = arith.constant 0 : i32
    %59 = arith.subi %arg1, %c0_i32 : i32
    %c1_i32 = arith.constant 1 : i32
    %c1_i32_29 = arith.constant 1 : i32
    %60 = arith.subi %c1_i32, %c1_i32_29 : i32
    %61 = arith.addi %59, %60 : i32
    %c1_i32_30 = arith.constant 1 : i32
    %62 = arith.divsi %61, %c1_i32_30 : i32
    %c1_i32_31 = arith.constant 1 : i32
    %c0_i32_32 = arith.constant 0 : i32
    %c0_i32_33 = arith.constant 0 : i32
    %63 = arith.subi %62, %c0_i32_33 : i32
    %64 = arith.addi %c0_i32_33, %63 : i32
    %c1_i32_34 = arith.constant 1 : i32
    scf.for %arg14 = %c0_i32_33 to %64 step %c1_i32_34  : i32 {
      %96 = arith.muli %arg14, %c1_i32_31 : i32
      %97 = arith.addi %c0_i32_32, %96 : i32
      %98 = arith.index_cast %97 : i32 to index
      %c0_55 = arith.constant 0 : index
      %c0_56 = arith.constant 0 : index
      %c0_57 = arith.constant 0 : index
      %99 = vector.load %arg9[%98, %c0_55, %c0_56, %c0_57] : memref<2x4x16x16xbf16, #tpu.memory_space<vmem>>, vector<1x4x16x16xbf16>
      %100 = vector.shape_cast %99 : vector<1x4x16x16xbf16> to vector<4x16x16xbf16>
      "tpu.trace_start"() <{level = 10 : i32, message = "hqd,hkd->hqk"}> : () -> ()
      %cst_58 = arith.constant dense<0.000000e+00> : vector<4x16x16xf32>
      %101 = tpu.matmul %21, %100, %cst_58 {dimension_numbers = #tpu.dot_dimension_numbers<[2], [2], [1], [1], [0, 0, 0, 1, 1, 1], [0], [0]>} : vector<4x16x16xbf16>, vector<4x16x16xbf16>, vector<4x16x16xf32> -> vector<4x16x16xf32>
      "tpu.trace_stop"() : () -> ()
      %c0_59 = arith.constant 0 : index
      %c0_60 = arith.constant 0 : index
      %c0_61 = arith.constant 0 : index
      %102 = vector.load %arg11[%c0_59, %c0_60, %c0_61] : memref<4x16x1xf32, #tpu.memory_space<vmem>>, vector<4x16x1xf32>
      %cst_62 = arith.constant dense<0xFF800000> : vector<4x16xf32>
      %103 = vector.multi_reduction <maximumf>, %101, %cst_62 [2] : vector<4x16x16xf32> to vector<4x16xf32>
      %104 = vector.shape_cast %103 : vector<4x16xf32> to vector<4x16x1xf32>
      %105 = arith.maximumf %102, %104 : vector<4x16x1xf32>
      %106 = arith.subf %102, %105 : vector<4x16x1xf32>
      %107 = math.exp %106 : vector<4x16x1xf32>
      %108 = vector.broadcast %105 : vector<4x16x1xf32> to vector<4x16x16xf32>
      %109 = arith.subf %101, %108 : vector<4x16x16xf32>
      %110 = math.exp %109 : vector<4x16x16xf32>
      %c0_63 = arith.constant 0 : index
      %c0_64 = arith.constant 0 : index
      %c0_65 = arith.constant 0 : index
      %111 = vector.load %arg12[%c0_63, %c0_64, %c0_65] : memref<4x16x1xf32, #tpu.memory_space<vmem>>, vector<4x16x1xf32>
      %112 = arith.mulf %107, %111 : vector<4x16x1xf32>
      %cst_66 = arith.constant dense<0.000000e+00> : vector<4x16xf32>
      %113 = vector.multi_reduction <add>, %110, %cst_66 [2] : vector<4x16x16xf32> to vector<4x16xf32>
      %114 = vector.shape_cast %113 : vector<4x16xf32> to vector<4x16x1xf32>
      %115 = arith.addf %112, %114 : vector<4x16x1xf32>
      %c0_67 = arith.constant 0 : index
      %c0_68 = arith.constant 0 : index
      %c0_69 = arith.constant 0 : index
      %116 = vector.load %arg12[%c0_67, %c0_68, %c0_69] : memref<4x16x1xf32, #tpu.memory_space<vmem>>, vector<4x16x1xf32>
      tpu.vector_store %arg12[%c0_67, %c0_68, %c0_69], %115 {strides = array<i32>} : memref<4x16x1xf32, #tpu.memory_space<vmem>>, vector<4x16x1xf32>,
      %c0_70 = arith.constant 0 : index
      %c0_71 = arith.constant 0 : index
      %c0_72 = arith.constant 0 : index
      %117 = vector.load %arg13[%c0_70, %c0_71, %c0_72] : memref<4x16x16xf32, #tpu.memory_space<vmem>>, vector<4x16x16xf32>
      %118 = vector.broadcast %107 : vector<4x16x1xf32> to vector<4x16x16xf32>
      %119 = arith.mulf %118, %117 : vector<4x16x16xf32>
      %120 = arith.truncf %110 : vector<4x16x16xf32> to vector<4x16x16xbf16>
      %121 = arith.index_cast %97 : i32 to index
      %c0_73 = arith.constant 0 : index
      %c0_74 = arith.constant 0 : index
      %c0_75 = arith.constant 0 : index
      %122 = vector.load %arg10[%121, %c0_73, %c0_74, %c0_75] : memref<2x4x16x16xbf16, #tpu.memory_space<vmem>>, vector<1x4x16x16xbf16>
      %123 = vector.shape_cast %122 : vector<1x4x16x16xbf16> to vector<4x16x16xbf16>
      "tpu.trace_start"() <{level = 10 : i32, message = "hqk,hkd->hqd"}> : () -> ()
      %cst_76 = arith.constant dense<0.000000e+00> : vector<4x16x16xf32>
      %124 = tpu.matmul %120, %123, %cst_76 {dimension_numbers = #tpu.dot_dimension_numbers<[2], [1], [1], [2], [0, 0, 0, 1, 1, 2], [0], [0]>} : vector<4x16x16xbf16>, vector<4x16x16xbf16>, vector<4x16x16xf32> -> vector<4x16x16xf32>
      "tpu.trace_stop"() : () -> ()
      %125 = arith.addf %119, %124 : vector<4x16x16xf32>
      %c0_77 = arith.constant 0 : index
      %c0_78 = arith.constant 0 : index
      %c0_79 = arith.constant 0 : index
      %126 = vector.load %arg13[%c0_77, %c0_78, %c0_79] : memref<4x16x16xf32, #tpu.memory_space<vmem>>, vector<4x16x16xf32>
      tpu.vector_store %arg13[%c0_77, %c0_78, %c0_79], %125 {strides = array<i32>} : memref<4x16x16xf32, #tpu.memory_space<vmem>>, vector<4x16x16xf32>,
      %c0_80 = arith.constant 0 : index
      %c0_81 = arith.constant 0 : index
      %c0_82 = arith.constant 0 : index
      %127 = vector.load %arg11[%c0_80, %c0_81, %c0_82] : memref<4x16x1xf32, #tpu.memory_space<vmem>>, vector<4x16x1xf32>
      tpu.vector_store %arg11[%c0_80, %c0_81, %c0_82], %105 {strides = array<i32>} : memref<4x16x1xf32, #tpu.memory_space<vmem>>, vector<4x16x1xf32>,
    }
    %c0_35 = arith.constant 0 : index
    %c0_36 = arith.constant 0 : index
    %c0_37 = arith.constant 0 : index
    %65 = vector.load %arg13[%c0_35, %c0_36, %c0_37] : memref<4x16x16xf32, #tpu.memory_space<vmem>>, vector<4x16x16xf32>
    %c0_38 = arith.constant 0 : index
    %c0_39 = arith.constant 0 : index
    %c0_40 = arith.constant 0 : index
    %66 = vector.load %arg12[%c0_38, %c0_39, %c0_40] : memref<4x16x1xf32, #tpu.memory_space<vmem>>, vector<4x16x1xf32>
    %67 = tpu.reciprocal %66 {approx = true} : vector<4x16x1xf32> -> vector<4x16x1xf32>
    %68 = vector.broadcast %67 : vector<4x16x1xf32> to vector<4x16x16xf32>
    %69 = arith.mulf %65, %68 : vector<4x16x16xf32>
    %70 = tpu.transpose %69, [1, 0, 2] : vector<4x16x16xf32> -> vector<16x4x16xf32>
    %71 = vector.shape_cast %70 : vector<16x4x16xf32> to vector<16x64xf32>
    %72 = arith.truncf %71 : vector<16x64xf32> to vector<16x64xbf16>
    %c0_41 = arith.constant 0 : index
    %c0_42 = arith.constant 0 : index
    %73 = vector.load %arg6[%c0_41, %c0_42] : memref<64x64xbf16, #tpu.memory_space<vmem>>, vector<64x64xbf16>
    %cst_43 = arith.constant dense<0.000000e+00> : vector<16x64xf32>
    %74 = tpu.matmul %72, %73, %cst_43 {dimension_numbers = #tpu.dot_dimension_numbers<[1], [0], [0], [1], [0, 0, 1, 1], [], []>} : vector<16x64xbf16>, vector<64x64xbf16>, vector<16x64xf32> -> vector<16x64xf32>
    %75 = arith.addf %1, %74 : vector<16x64xf32>
    %c0_44 = arith.constant 0 : index
    %c0_45 = arith.constant 0 : index
    %c0_46 = arith.constant 0 : index
    %76 = vector.load %arg7[%c0_44, %c0_45, %c0_46] : memref<1x16x64xf32, #tpu.memory_space<vmem>>, vector<1x16x64xf32>
    %77 = vector.shape_cast %76 : vector<1x16x64xf32> to vector<16x64xf32>
    %78 = vector.shape_cast %75 : vector<16x64xf32> to vector<1x16x64xf32>
    tpu.vector_store %arg7[%c0_44, %c0_45, %c0_46], %78 {strides = array<i32>} : memref<1x16x64xf32, #tpu.memory_space<vmem>>, vector<1x16x64xf32>,
    %c0_47 = arith.constant 0 : index
    %c0_48 = arith.constant 0 : index
    %79 = vector.load %arg4[%c0_47, %c0_48] : memref<1x64xf32, #tpu.memory_space<vmem>>, vector<1x64xf32>
    %80 = arith.mulf %75, %75 : vector<16x64xf32>
    %cst_49 = arith.constant dense<0.000000e+00> : vector<16xf32>
    %81 = vector.multi_reduction <add>, %80, %cst_49 [1] : vector<16x64xf32> to vector<16xf32>
    %82 = vector.shape_cast %81 : vector<16xf32> to vector<16x1xf32>
    %cst_50 = arith.constant 6.400000e+01 : f32
    %83 = vector.broadcast %cst_50 : f32 to vector<16x1xf32>
    %84 = arith.divf %82, %83 : vector<16x1xf32>
    %cst_51 = arith.constant 9.99999974E-6 : f32
    %85 = vector.broadcast %cst_51 : f32 to vector<16x1xf32>
    %86 = arith.addf %84, %85 : vector<16x1xf32>
    %87 = math.rsqrt %86 : vector<16x1xf32>
    %88 = vector.broadcast %87 : vector<16x1xf32> to vector<16x64xf32>
    %89 = arith.mulf %75, %88 : vector<16x64xf32>
    %90 = vector.broadcast %79 : vector<1x64xf32> to vector<16x64xf32>
    %91 = arith.mulf %89, %90 : vector<16x64xf32>
    %92 = arith.truncf %91 : vector<16x64xf32> to vector<16x64xbf16>
    %c0_52 = arith.constant 0 : index
    %c0_53 = arith.constant 0 : index
    %c0_54 = arith.constant 0 : index
    %93 = vector.load %arg8[%c0_52, %c0_53, %c0_54] : memref<1x16x64xbf16, #tpu.memory_space<vmem>>, vector<1x16x64xbf16>
    %94 = vector.shape_cast %93 : vector<1x16x64xbf16> to vector<16x64xbf16>
    %95 = vector.shape_cast %92 : vector<16x64xbf16> to vector<1x16x64xbf16>
    tpu.vector_store %arg8[%c0_52, %c0_53, %c0_54], %95 {strides = array<i32>} : memref<1x16x64xbf16, #tpu.memory_space<vmem>>, vector<1x16x64xbf16>,
    return
  }
  func.func @transform_0(%arg0: i32, %arg1: i32) -> (i32, i32, i32) {
    %c0_i32 = arith.constant 0 : i32
    %c0_i32_0 = arith.constant 0 : i32
    return %arg0, %arg1, %c0_i32 : i32, i32, i32
  }
  func.func @transform_1(%arg0: i32, %arg1: i32) -> (i32, i32) {
    %c0_i32 = arith.constant 0 : i32
    %c0_i32_0 = arith.constant 0 : i32
    %c0_i32_1 = arith.constant 0 : i32
    return %c0_i32, %c0_i32_0 : i32, i32
  }
  func.func @transform_2(%arg0: i32, %arg1: i32) -> (i32, i32) {
    %c0_i32 = arith.constant 0 : i32
    %c0_i32_0 = arith.constant 0 : i32
    %c0_i32_1 = arith.constant 0 : i32
    return %c0_i32, %c0_i32_0 : i32, i32
  }
  func.func @transform_3(%arg0: i32, %arg1: i32) -> (i32, i32) {
    %c0_i32 = arith.constant 0 : i32
    %c0_i32_0 = arith.constant 0 : i32
    %c0_i32_1 = arith.constant 0 : i32
    return %c0_i32, %c0_i32_0 : i32, i32
  }
  func.func @transform_4(%arg0: i32, %arg1: i32) -> (i32, i32) {
    %c0_i32 = arith.constant 0 : i32
    %c0_i32_0 = arith.constant 0 : i32
    %c0_i32_1 = arith.constant 0 : i32
    return %c0_i32, %c0_i32_0 : i32, i32
  }
  func.func @transform_5(%arg0: i32, %arg1: i32) -> (i32, i32, i32) {
    %c0_i32 = arith.constant 0 : i32
    %c0_i32_0 = arith.constant 0 : i32
    return %arg0, %arg1, %c0_i32 : i32, i32, i32
  }
  func.func @transform_6(%arg0: i32, %arg1: i32) -> (i32, i32, i32) {
    %c0_i32 = arith.constant 0 : i32
    %c0_i32_0 = arith.constant 0 : i32
    return %arg0, %arg1, %c0_i32 : i32, i32, i32
  }
}

</mosaic_0001>

<bundles_post_ra>
// kernel: tpu_custom_call.1
= control target key start
LH: loop header
LB: loop body
LE: loop exit
PB: predicated region body
PF: predicated region fallthrough
CT: control target
= control target key end

     0   :  { %6 = vsyncpa [#allocation3], 0  ;;  %s287_s0 = inlined_call_operand.hbm [shape: f32[8,128], index: 0, kind: input, shape index: {}]   ;;  %s288_s1 = inlined_call_operand.hbm [shape: f32[8,128], index: 1, kind: output, shape index: {}]  }
   0x1   :  { %7 = vsyncpa [#allocation4], 0  ;;  %s270_s6 = smov 0  }
   0x2 LB: > { %s149_s7 = sadd.s32 4294967295, %s256_s6   ;;  %p150_p0 = scmp.ge.s32.totalorder %s256_s6, 1  ;;  %s256_s6 = sphi %s270_s6, %s13_s6  }
   0x3   : > { %p60_p1 = scmp.lt.s32.totalorder %s256_s6, 3  ;;  %s72_s10 = sshll.u32 %s287_s0, 4  ;;  %s73_s10 = int_to_ptr.hbm [resolvable:$true] %s72_s10 }
   0x4   : > { %p170_p3 = scmp.eq.s32.totalorder %s149_s7, 0  ;;  %s258_s11 = smov [#allocation2]  }
   0x5   : > { %p61_p2 = pnand %p150_p0, %p60_p1  ;;  %s74_s12 = sshll.u32 %s258_s11, 4  ;;  %s75_s12 = int_to_ptr.vmem [resolvable:$true] %s74_s12 }
   0x7   : > { %p166_p4 = pneg %p61_p2  ;;  %87 = sbr.rel (%p61_p2) target bundleno = 20 (0x14), region = 24 }
   0x9   : > { %p167_p5 = pnand %p170_p3, %p166_p4 }
   0xb   : > { %169 = dma.hbm_to_vmem [thread:$0]  (!%p167_p5), %s73_s10, 128, %s75_s12, [#allocation3]  }
   0xc   : > { %247 = dma.done.wait (%p170_p3), [#allocation3], 128  }
   0xd   : > { %249 = vsyncadd (%p170_p3), [#allocation3], 4294967168  ;;  %s259_s13 = smov [#allocation5]   ;;  %s109_s17 = sshll.u32 %s288_s1, 4  ;;  %v98_v0 = vld [vmem:[#allocation2] sm:$0xff]  ;;  %s110_s17 = int_to_ptr.hbm [resolvable:$true] %s109_s17 }
   0xe   : > { %s107_s14 = sshll.u32 %s259_s13, 4  ;;  %p172_p6 = scmp.eq.s32.totalorder %s149_s7, 1  ;;  %v99_v1 = vadd.f32 1.0, %v98_v0  ;;  %s108_s14 = int_to_ptr.vmem [resolvable:$true] %s107_s14 }
  0x10   : > { %100 = vst [vmem:[#allocation5] sm:$0xff] %v99_v1 }
  0x11   : > { %163 = dma.vmem_to_hbm [thread:$0]  (%p172_p6), %s108_s14, 128, %s110_s17, [#allocation4]  }
  0x12   : > { %251 = dma.done.wait (%p172_p6), [#allocation4], 128  }
  0x13   : > { %253 = vsyncadd (%p172_p6), [#allocation4], 4294967168 }
  0x14 PF: > { %s13_s6 = sadd.s32 1, %s256_s6  }
  0x15   : > { %p10_p7 = scmp.ge.s32.totalorder %s13_s6, 4  }
  0x17   :  { %12 = sbr.rel (!%p10_p7) target bundleno = 2 (0x2), region = 53 }
  0x1c   :  { %123 = vsyncpa [#allocation3], 1 }
  0x1d   :  { %125 = vsyncpa [#allocation3 + $0x1], 1 }
  0x1e   :  { %126 = vsyncpa [#allocation4], 1 }
  0x1f   :  { %128 = vsyncpa [#allocation4 + $0x1], 1 }

// kernel: tpu_custom_call.1
= control target key start
LH: loop header
LB: loop body
LE: loop exit
PB: predicated region body
PF: predicated region fallthrough
CT: control target
= control target key end

     0   :  { %s4380_s0 = inlined_call_operand.hbm [shape: f32[2,32,64], index: 0, kind: input, shape index: {}]   ;;  %s4381_s1 = inlined_call_operand.hbm [shape: f32[1,64], index: 1, kind: input, shape index: {}]   ;;  %s4382_s2 = inlined_call_operand.vmem [shape: f32[1,64], index: 2, kind: input, shape index: {}]   ;;  %s4383_s3 = inlined_call_operand.hbm [shape: bf16[64,192], index: 3, kind: input, shape index: {}]   ;;  %s4384_s4 = inlined_call_operand.hbm [shape: bf16[64,64], index: 4, kind: input, shape index: {}]   ;;  %s4385_s5 = inlined_call_operand.hbm [shape: f32[2,32,64], index: 5, kind: output, shape index: {0}]   ;;  %s4386_s6 = inlined_call_operand.hbm [shape: bf16[2,32,64], index: 6, kind: output, shape index: {1}]  }
   0x1   :  { %4395 = sst [smem:[#allocation27_spill]] %s4381_s1 }
   0x2   :  { %4396 = sst [smem:[#allocation28_spill]] %s4382_s2 }
   0x3   :  { %4397 = sst [smem:[#allocation29_spill]] %s4383_s3 }
   0x4   :  { %4398 = sst [smem:[#allocation30_spill]] %s4384_s4 }
   0x5   :  { %4399 = sst [smem:[#allocation31_spill]] %s4386_s6 }
   0x6   :  { %12 = vsyncpa [#allocation8], 0 }
   0x7   :  { %14 = vsyncpa [#allocation8 + $0x1], 0 }
   0x8   :  { %15 = vsyncpa [#allocation11], 0 }
   0x9   :  { %16 = vsyncpa [#allocation14], 0 }
   0xa   :  { %17 = vsyncpa [#allocation9], 0 }
   0xb   :  { %19 = vsyncpa [#allocation9 + $0x1], 0 }
   0xc   :  { %20 = vsyncpa [#allocation17], 0 }
   0xd   :  { %22 = vsyncpa [#allocation17 + $0x1], 0  ;;  %s3443_s21 = smov 0   ;;  %s3445_s22 = smov 0  }
   0xe   :  { %s3447_s23 = smov 0   ;;  %s3449_s24 = smov 0  }
   0xf   :  { %s3451_s25 = smov 0   ;;  %s3453_s26 = smov 0  }
  0x10   :  { %s3455_s27 = smov 0   ;;  %s3457_s28 = smov 0  }
  0x11 LB: > { %4400 = sst [smem:[#allocation23_spill]] %s3352_s21  ;;  %s4387_s29 = sadd.s32 4294967295, %s3380_s28   ;;  %s3380_s28 = sphi %s3457_s28, %s28_s28   ;;  %s3376_s27 = sphi %s3455_s27, %s4429_s27   ;;  %s3372_s26 = sphi %s3453_s26, %s4428_s26   ;;  %s3368_s25 = sphi %s3451_s25, %s4427_s25   ;;  %s3364_s24 = sphi %s3449_s24, %s4426_s24   ;;  %s3360_s23 = sphi %s3447_s23, %s4425_s23   ;;  %s3356_s22 = sphi %s3445_s22, %s4424_s22   ;;  %s3352_s21 = sphi %s3443_s21, %s4423_s21  }
  0x12   : > { %s2723_s30 = sadd.s32 4294967294, %s3380_s28   ;;  %p62_p0 = scmp.ne.s32.totalorder %s3356_s22, %s3352_s21 }
  0x13   : > { %p3489_p1 = scmp.eq.s32.totalorder %s4387_s29, 0  ;;  %p178_p2 = scmp.eq.s32.totalorder %s2723_s30, 3 }
  0x14   : > { %p2724_p4 = scmp.ge.s32.totalorder %s3380_s28, 1  ;;  %p213_p6 = scmp.lt.s32.totalorder %s3380_s28, 5 }
  0x15   : > { %p3495_p3 = por %p3489_p1, %p62_p0  ;;  %p3500_p5 = por %p178_p2, %p62_p0 }
  0x16   : > { %s4405_s1 = sld [smem:[#allocation27_spill]]  ;;  %p3508_p7 = pnand %p2724_p4, %p213_p6 }
  0x17   : > { %s4403_s9 = scalar_select %p3500_p5, 1, 0 }
  0x18   : > { %p2898_p8 = pneg %p3508_p7  ;;  %s3386_s14 = smov [#allocation10]  }
  0x19   : > { %4404 = sst [smem:[#allocation24_spill]] %s4403_s9  ;;  %s227_s15 = sshll.u32 %s3386_s14, 4  ;;  %s228_s15 = int_to_ptr.vmem [resolvable:$true] %s227_s15 }
  0x1a   : > { %s4407_s3 = sld [smem:[#allocation29_spill]]  ;;  %p3519_p9 = pnand %p2898_p8, %p3489_p1 }
  0x1b   : > { %s3387_s20 = smov [#allocation12]   ;;  %s4388_s10 = smov 128  }
  0x1c   : > { %s225_s12 = sshll.u32 %s4405_s1, 4  ;;  %s241_s30 = sshll.u32 %s3387_s20, 4  ;;  %s226_s12 = int_to_ptr.hbm [resolvable:$true] %s225_s12  ;;  %s242_s30 = int_to_ptr.vmem [resolvable:$true] %s241_s30 }
  0x1d   : > { %2901 = dma.hbm_to_vmem [thread:$0]  (!%p3519_p9), %s226_s12, 16, %s228_s15, [#allocation11]  }
  0x1e   : > { %s4389_s11 = smov 8   ;;  %s4409_s4 = sld [smem:[#allocation30_spill]] }
  0x1f   : > { %s3390_s12 = smov [#allocation13]   ;;  %s3391_s20 = smov 64  }
  0x20   : > { %s239_s18 = sshll.u32 %s4407_s3, 4  ;;  %s255_s15 = sshll.u32 %s3390_s12, 4  ;;  %s240_s18 = int_to_ptr.hbm [resolvable:$true] %s239_s18  ;;  %s256_s15 = int_to_ptr.vmem [resolvable:$true] %s255_s15 }
  0x21   : > { %2904 = dma.hbm_to_vmem [thread:$0]  (!%p3519_p9), %s240_s18, 1024, %s242_s30, [#allocation11], %s4388_s10, %s4388_s10, %s4389_s11  }
  0x22   : > { %s3392_s29 = smov 4   ;;  %s37_s1 = sadd.s32 1, %s3372_s26 }
  0x23   : > { %p38_p10 = scmp.ge.s32.totalorder %s37_s1, 2  ;;  %s40_s18 = sadd.s32 1, %s3376_s27 }
  0x24   : > { %s253_s17 = sshll.u32 %s4409_s4, 4  ;;  %s4410_s30 = sadd.s32 4294967295, %s3380_s28   ;;  %s254_s17 = int_to_ptr.hbm [resolvable:$true] %s253_s17 }
  0x25   : > { %2907 = dma.hbm_to_vmem [thread:$0]  (!%p3519_p9), %s254_s17, 512, %s256_s15, [#allocation14], %s3391_s20, %s3391_s20, %s3392_s29  }
  0x26   : > { %p172_p11 = scmp.eq.s32.totalorder %s4410_s30, 3  ;;  %p56_p12 = scmp.ne.s32.totalorder %s3360_s23, %s3356_s22 }
  0x27   : > { %s4431_s1 = smov (%p38_p10, %s37_s1), 0  ;;  %s4433_s18 = smov (!%p38_p10, %s40_s18), %s3376_s27 }
  0x28   : > { %4411 = sst [smem:[#allocation25_spill]] %s4431_s1  ;;  %s49_s14 = sadd.s32 1, %s3360_s23 }
  0x29   : > { %p57_p13 = scmp.eq.s32.totalorder %s3380_s28, 0  ;;  %p42_p0 = scmp.ge.s32.totalorder %s4433_s18, 2 }
  0x2a   : > { %p3546_p2 = por %p172_p11, %p56_p12  ;;  %s45_s19 = ssub.s32 %s3372_s26, %s4431_s1 }
  0x2b   : > { %p3552_p4 = por %p57_p13, %p56_p12  ;;  %s4435_s18 = smov (%p42_p0, %s4433_s18), 0 }
  0x2c   : > { %4414 = sst [smem:[#allocation26_spill]] %s4435_s18  ;;  %p2922_p6 = scmp.lt.s32.totalorder %s3380_s28, 4 }
  0x2d   : > { %s269_s17 = sand.u32 1, %s3360_s23   ;;  %s44_s12 = ssub.s32 %s3376_s27, %s4435_s18 }
  0x2e   : > { %s2730_s15 = sshll.u32 %s3372_s26, 1  ;;  %s46_s20 = sor.u32 %s45_s19, %s44_s12 }
  0x2f   : > { %s2729_s30 = sshll.u32 %s269_s17, 4  ;;  %p47_p8 = scmp.eq.s32.totalorder %s46_s20, 0 }
  0x30   : > { %s2731_s10 = sshll.u32 %s3376_s27, 2  ;;  %s273_s11 = scalar_lea.vmem [#allocation7], %s2729_s30 }
  0x31   : > { %s283_s3 = sshll.u32 %s273_s11, 4  ;;  %s278_s1 = sadd.s32 %s2731_s10, %s2730_s15  ;;  %s284_s3 = int_to_ptr.vmem [resolvable:$true] %s283_s3 }
  0x32   : > { %s3565_s4 = scalar_select %p47_p8, %s3360_s23, %s49_s14  }
  0x33   : > { %s2732_s9 = sshll.u32 %s278_s1, 3  ;;  %p2909_p9 = pnand %p2922_p6, %p3552_p4 }
  0x34   : > { %s280_s2 = scalar_lea.hbm %s4380_s0, %s2732_s9  ;;  %s270_s19 = scalar_lea.sflag [#allocation8], %s269_s17 }
  0x35   : > { %s281_s18 = sshll.u32 %s280_s2, 4  ;;  %s4415_s12 = smov 8   ;;  %s282_s18 = int_to_ptr.hbm [resolvable:$true] %s281_s18 }
  0x36   : > { %s4416_s20 = smov 128   ;;  %295 = sbr.rel (%p3508_p7) target bundleno = 2206 (0x89e), region = 40 }
  0x37   : > { %2911 = dma.hbm_to_vmem [thread:$0]  (!%p2909_p9), %s282_s18, 256, %s284_s3, %s270_s19, %s4416_s20, %s4416_s20, %s4415_s12  }
  0x38   : > { %s3580_s1 = sand.u32 (!%p3508_p7), 1, %s3356_s22  }
  0x39   : > { %s2734_s6 = sshll.u32 (!%p3508_p7), %s3580_s1, 4  ;;  %s298_s21 = scalar_lea.sflag (!%p3508_p7), [#allocation8], %s3580_s1 }
  0x3a   : > { %s301_s2 = scalar_lea.vmem (!%p3508_p7), [#allocation7], %s2734_s6 }
  0x3b   : > { %3331 = dma.done.wait (%p3495_p3), %s298_s21, 256  }
  0x3c   : > { %3333 = vsyncadd (%p3495_p3), %s298_s21, 4294967040 }
  0x3d   : > { %3335 = dma.done.wait (%p3489_p1), [#allocation11], 1040  }
  0x3e   : > { %3337 = vsyncadd (%p3489_p1), [#allocation11], 4294966256 }
  0x3f   : > { %3339 = dma.done.wait (%p3489_p1), [#allocation14], 512  }
  0x40   : > { %3341 = vsyncadd (%p3489_p1), [#allocation14], 4294966784  ;;  %v3598_v0 = vld [vmem:[%s301_s2] sm:$0xff]  ;;  %vm360_vm0 = vcmask 523264   ;;  %v3602_v2 = vld [vmem:[%s301_s2 + $0x8] sm:$0xff]  ;;  %s2739_s3 = sshll.u32 %s3580_s1, 3 }
  0x41   : > { %v358_v1 = vmul.f32 %v3598_v0, %v3598_v0  ;;  %v359_v4 = vmul.f32 %v3602_v2, %v3602_v2  ;;  %v3393_v6 = vmov 64.0   ;;  %v2766_v10 = vld [vmem:[#allocation12 + $0x30] sm:$0xf]  ;;  %v2863_v11 = vld [vmem:[#allocation12 + $0x34] sm:$0xf0]  ;;  %s3394_s7 = smov 80  }
  0x42   : > { %3022 = vrcp.f32 %v3393_v6  ;;  %v2862_v12 = vld [vmem:[#allocation12 + $0x34] sm:$0xf]  ;;  %v2767_v13 = vor.u32 %v2863_v11, %v2766_v10  ;;  %v2768_v14 = vld [vmem:[#allocation12 + $0x38] sm:$0xf0]  ;;  %v2758_v17 = vld [vmem:[#allocation12 + $0x20] sm:$0xf] }
  0x43   : > { %v361_v3 = vsel %vm360_vm0, %v358_v1, 0.0  ;;  %v364_v5 = vsel %vm360_vm0, %v359_v4, 0.0  ;;  %v2771_v15 = vor.u32 %v2862_v12, %v2768_v14  ;;  %v2861_v18 = vld [vmem:[#allocation12 + $0x24] sm:$0xf0]  ;;  %v2860_v19 = vld [vmem:[#allocation12 + $0x24] sm:$0xf] }
  0x44   : > { %362 = vadd.xlane.f32.xlu0 %v361_v3  ;;  %461 = vmatpush.bf16.msra.mxu0 %v2767_v13  ;;  %v2759_v20 = vor.u32 %v2861_v18, %v2758_v17  ;;  %v2760_v21 = vld [vmem:[#allocation12 + $0x28] sm:$0xf0]  ;;  %v2750_v24 = vld [vmem:[#allocation12 + $0x10] sm:$0xf]  ;;  %v2859_v25 = vld [vmem:[#allocation12 + $0x14] sm:$0xf0] }
  0x45   : > { %475 = vmatpush.bf16.msra.mxu1 %v2771_v15  ;;  %v2763_v22 = vor.u32 %v2860_v19, %v2760_v21  ;;  %v2858_v26 = vld [vmem:[#allocation12 + $0x14] sm:$0xf]  ;;  %v2751_v27 = vor.u32 %v2859_v25, %v2750_v24  ;;  %v2752_v28 = vld [vmem:[#allocation12 + $0x18] sm:$0xf0]  ;;  %v2742_v31 = vld [vmem:[#allocation12] sm:$0xf] }
  0x46   : > { %v2755_v29 = vor.u32 %v2858_v26, %v2752_v28  ;;  %v2857_v32 = vld [vmem:[#allocation12 + $0x4] sm:$0xf0]  ;;  %v2856_v33 = vld [vmem:[#allocation12 + $0x4] sm:$0xf]  ;;  %v2744_v35 = vld [vmem:[#allocation12 + $0x8] sm:$0xf0] }
  0x47   : > { %v2743_v34 = vor.u32 %v2857_v32, %v2742_v31  ;;  %v2747_v37 = vor.u32 %v2856_v33, %v2744_v35  ;;  %v3021_v57 = vld [vmem:[#allocation10] ss:$0 sm:$0xff]  ;;  %s3395_s8 = smov 96   ;;  %s3396_s9 = smov 112   ;;  %v3399_v15 = vmov 1934713408  }
  0x48   : > { %v3023_v7 = vpop.eup %3022  ;;  %462 = vmatpush.bf16.msra.mxu0 %v2759_v20  ;;  %s3397_s13 = smov 64   ;;  %vm536_vm8 = vcmask 1047556   ;;  %vm1237_vm9 = vcmask 125952   ;;  %s2864_s10 = sshll.u32 %s3364_s24, 5  ;;  %vm1262_vm10 = vcmask 130048   ;;  %vm1428_vm13 = vcmask 7168  }
  0x49   : > { %v368_v8 = vmul.f32 64.0, %v3023_v7  ;;  %vm372_vm1 = vweird.f32 %v3023_v7  ;;  %476 = vmatpush.bf16.msra.mxu1 %v2763_v22  ;;  %s3902_s11 = scalar_lea.vmem [#allocation2], %s2864_s10  ;;  %s3956_s18 = scalar_lea.vmem [#allocation3], %s2864_s10 }
  0x4a   : > { %s4040_s14 = scalar_lea.vmem [#allocation15], %s2734_s6  ;;  %s4044_s16 = scalar_lea.vmem [#allocation16], %s2739_s3 }
  0x4b   : > { %v369_v9 = vsub.f32 1.0, %v368_v8  ;;  %p2785_p1 = scmp.le.s32.totalorder %s3364_s24, 0 }
  0x4c   : > { %365 = vadd.xlane.f32.xlu0 %v364_v5  ;;  %463 = vmatpush.bf16.msra.mxu0 %v2751_v27  ;;  %s4047_s17 = smov (!%p2785_p1), 0  }
  0x4d   : > { %v370_v16 = vmul.f32 %v3023_v7, %v369_v9  ;;  %477 = vmatpush.bf16.msra.mxu1 %v2755_v29  ;;  %v3398_v9 = vmov 1983009808  }
  0x4e   : > { %v527_v10 = vunpack.c.l.s4 %v3398_v9 }
  0x4f   : > { %v371_v23 = vadd.f32 %v3023_v7, %v370_v16  ;;  %v541_v16 = vunpack.c.l.s4 %v3399_v15 }
  0x50   : > { %464 = vmatpush.bf16.msra.mxu0 %v2743_v34  ;;  %v3641_v13 = vunpack.c.0.s8 %v527_v10 }
  0x51   : > { %v3609_v30 = vsel %vm372_vm1, %v3023_v7, %v371_v23  ;;  %478 = vmatpush.bf16.msra.mxu1 %v2747_v37  ;;  %v3647_v26 = vunpack.c.0.s8 %v541_v16 }
  0xb7   : > { %v363_v36 = vpop.xlane.xlu0 %362 }
  0xb8   : > { %v374_v38 = vmul.f32 %v3609_v30, %v363_v36 }
  0xba   : > { %v376_v39 = vadd.f32 1e-05, %v374_v38 }
  0xbc   : > { %3024 = vrsqrt.f32 %v376_v39  ;;  %vm384_vm3 = vweird.f32 %v376_v39 }
  0xbf   : > { %v366_v40 = vpop.xlane.xlu0 %365 }
  0xc0   : > { %v375_v41 = vmul.f32 %v3609_v30, %v366_v40 }
  0xc2   : > { %v3025_v42 = vpop.eup %3024  ;;  %v377_v43 = vadd.f32 1e-05, %v375_v41 }
  0xc3   : > { %v379_v44 = vmul.f32 %v3025_v42, %v376_v39  ;;  %vm385_vm2 = vweird.f32 %v3025_v42 }
  0xc4   : > { %3026 = vrsqrt.f32 %v377_v43  ;;  %vm386_vm4 = vmor %vm384_vm3, %vm385_vm2  ;;  %vm394_vm6 = vweird.f32 %v377_v43 }
  0xc5   : > { %v380_v45 = vmul.f32 %v3025_v42, %v379_v44 }
  0xc7   : > { %v381_v46 = vmul.f32 0.5, %v380_v45 }
  0xc9   : > { %v382_v47 = vsub.f32 1.5, %v381_v46 }
  0xca   : > { %v3027_v48 = vpop.eup %3026 }
  0xcb   : > { %v389_v49 = vmul.f32 %v3027_v48, %v377_v43  ;;  %v383_v50 = vmul.f32 %v3025_v42, %v382_v47  ;;  %vm395_vm5 = vweird.f32 %v3027_v48 }
  0xcc   : > { %vm396_vm7 = vmor %vm394_vm6, %vm395_vm5 }
  0xcd   : > { %v390_v51 = vmul.f32 %v3027_v48, %v389_v49  ;;  %v387_v53 = vsel %vm386_vm4, %v3025_v42, %v383_v50 }
  0xce   : > { %v398_v56 = vmul.f32 %v387_v53, %v3598_v0 }
  0xcf   : > { %v391_v52 = vmul.f32 0.5, %v390_v51 }
  0xd0   : > { %v403_v60 = vmul.f32 %v3021_v57, %v398_v56 }
  0xd1   : > { %v392_v54 = vsub.f32 1.5, %v391_v52 }
  0xd3   : > { %v393_v55 = vmul.f32 %v3027_v48, %v392_v54 }
  0xd5   : > { %v397_v58 = vsel %vm396_vm7, %v3027_v48, %v393_v55 }
  0xd6   : > { %v399_v59 = vmul.f32 %v397_v58, %v3602_v2 }
  0xd8   : > { %v404_v61 = vmul.f32 %v3021_v57, %v399_v59 }
  0xda   : > { %v405_v62 = vpack.c.bf16 %v404_v61, %v403_v60 }
  0xdc   : > { %2772 = vmatmul.msk.bf16.vlgmr.msra.gmra.mxu0 %vm360_vm0, %v405_v62  ;;  %2773 = vmatmul.msk.bf16.vlgmr.msra.gmra.mxu1 %vm360_vm0, %v405_v62 }
 0x159   : > { %v466_v63 = vpop.f32.mrf.mxu0  ;;  %v480_v7 = vpop.f32.mrf.mxu1 }
 0x15a   : > { %v485_v1 = vpack.c.bf16 %v466_v63, %v466_v63  ;;  %v3635_v8 = vpack.c.bf16 %v480_v7, %v480_v7 }
 0x15c   : > { %497 = vrot.lane.b32.xlu0 %v485_v1, %s3394_s7  ;;  %493 = vrot.lane.b32.xlu2 %v485_v1, %s3395_s8  ;;  %v504_v22 = vshrl.u32 %v485_v1, 16 }
 0x15d   : > { %489 = vrot.lane.b32.xlu1 %v485_v1, %s3396_s9 }
 0x161   : > { %v468_v3 = vpop.f32.mrf.mxu0  ;;  %v482_v11 = vpop.f32.mrf.mxu1 }
 0x162   : > { %v3620_v4 = vpack.c.bf16 %v468_v3, %v468_v3  ;;  %v3639_v12 = vpack.c.bf16 %v482_v11, %v482_v11 }
 0x164   : > { %495 = vrot.lane.b32.xlu2 %v3620_v4, %s3395_s8  ;;  %v516_v44 = vshrl.u32 %v3620_v4, 16 }
 0x165   : > { %491 = vrot.lane.b32.xlu1 %v3620_v4, %s3396_s9 }
 0x16c   : > { %730 = vrot.lane.b32.xlu2 %v485_v1, %s3397_s13 }
 0x16d   : > { %499 = vrot.lane.b32.xlu1 %v3620_v4, %s3394_s7 }
 0x175   : > { %732 = vrot.lane.b32.xlu1 %v3620_v4, %s3397_s13 }
 0x1b6   : > { %v494_v5 = vpop.permute.xlu2 %493 }
 0x1b7   : > { %v510_v17 = vshrl.u32 %v494_v5, 16 }
 0x1be   : > { %v3631_v6 = vpop.permute.xlu2 %495 }
 0x1bf   : > { %740 = vrot.lane.b32.xlu0 %v3631_v6, %s3397_s13 }
 0x1c7   : > { %986 = vrot.lane.b32.xlu0 %v3635_v8, %s3396_s9 }
 0x1ce   : > { %v498_v14 = vpop.permute.xlu0 %497 }
 0x1cf   : > { %v509_v18 = vpack.i.b16 %v498_v14, %v494_v5  ;;  %v511_v19 = vshrl.u32 %v498_v14, 16  ;;  %v490_v20 = vpop.permute.xlu1 %489  ;;  %992 = vrot.lane.b32.xlu0 %v3639_v12, %s3395_s8 }
 0x1d0   : > { %v503_v21 = vpack.i.b16 %v490_v20, %v485_v1  ;;  %v505_v23 = vshrl.u32 %v490_v20, 16  ;;  %734 = vrot.lane.b32.xlu2 %v490_v20, %s3397_s13 }
 0x1d1   : > { %v512_v24 = vpack.i.b16 %v511_v19, %v510_v17  ;;  %v534_v25 = vperm.slane %v509_v18, %v3641_v13 }
 0x1d2   : > { %v506_v27 = vpack.i.b16 %v505_v23, %v504_v22  ;;  %v529_v28 = vperm.slane %v503_v21, %v3641_v13 }
 0x1d3   : > { %v535_v29 = vrot.slane %v534_v25, 4  ;;  %v561_v31 = vperm.slane %v512_v24, %v3641_v13 }
 0x1d4   : > { %v538_v32 = vrot.slane %v529_v28, 4  ;;  %v556_v33 = vperm.slane %v506_v27, %v3641_v13 }
 0x1d5   : > { %v562_v34 = vrot.slane %v561_v31, 4  ;;  %v537_v35 = vsel %vm536_vm8, %v535_v29, %v529_v28 }
 0x1d6   : > { %v539_v36 = vsel %vm536_vm8, %v534_v25, %v538_v32  ;;  %v543_v37 = vperm.slane %v537_v35, %v3647_v26  ;;  %v564_v38 = vrot.slane %v556_v33, 4 }
 0x1d7   : > { %v547_v39 = vperm.slane %v539_v36, %v3647_v26  ;;  %v563_v40 = vsel %vm536_vm8, %v562_v34, %v556_v33  ;;  %v492_v41 = vpop.permute.xlu1 %491 }
 0x1d8   : > { %v565_v42 = vsel %vm536_vm8, %v561_v31, %v564_v38  ;;  %v569_v43 = vperm.slane %v563_v40, %v3647_v26  ;;  %738 = vrot.lane.b32.xlu2 %v494_v5, %s3397_s13  ;;  %736 = vrot.lane.b32.xlu1 %v492_v41, %s3397_s13  ;;  %v548_v45 = vrot.slane %v543_v37, 4  ;;  %v517_v48 = vshrl.u32 %v492_v41, 16 }
 0x1d9   : > { %v550_v46 = vrot.slane %v547_v39, 4  ;;  %v573_v47 = vperm.slane %v565_v42, %v3647_v26  ;;  %v515_v50 = vpack.i.b16 %v492_v41, %v3620_v4  ;;  %v522_v4 = vshrl.u32 %v3631_v6, 16 }
 0x1da   : > { %v574_v49 = vrot.slane %v569_v43, 4  ;;  %v518_v54 = vpack.i.b16 %v517_v48, %v516_v44  ;;  %v549_v56 = vsel %vm536_vm8, 0, %v548_v45 }
 0x1db   : > { %v551_v51 = vsel %vm536_vm8, 0, %v550_v46  ;;  %v576_v52 = vrot.slane %v573_v47, 4  ;;  %v630_v53 = vsel %vm536_vm8, %v550_v46, %v543_v37  ;;  %v582_v61 = vperm.slane %v515_v50, %v3641_v13 }
 0x1dc   : > { %v635_v55 = vrot.slane %v551_v51, 4  ;;  %v575_v62 = vsel %vm536_vm8, 0, %v574_v49  ;;  %v608_v63 = vperm.slane %v518_v54, %v3641_v13  ;;  %v634_v10 = vperm.slane %v630_v53, %v3641_v13 }
 0x1dd   : > { %v577_v57 = vsel %vm536_vm8, 0, %v576_v52  ;;  %v649_v58 = vsel %vm536_vm8, %v576_v52, %v569_v43  ;;  %v590_v16 = vrot.slane %v582_v61, 4 }
 0x1de   : > { %v636_v59 = vsel %vm536_vm8, %v635_v55, %v549_v56  ;;  %v654_v60 = vrot.slane %v577_v57, 4  ;;  %v616_v19 = vrot.slane %v608_v63, 4 }
 0x1df   : > { %v500_v1 = vpop.permute.xlu1 %499  ;;  %v640_v3 = vperm.slane %v636_v59, %v3641_v13 }
 0x1e0   : > { %v521_v5 = vpack.i.b16 %v500_v1, %v3631_v6  ;;  %v523_v7 = vshrl.u32 %v500_v1, 16  ;;  %742 = vrot.lane.b32.xlu1 %v498_v14, %s3397_s13  ;;  %744 = vrot.lane.b32.xlu2 %v500_v1, %s3397_s13  ;;  %v655_v9 = vsel %vm536_vm8, %v654_v60, %v575_v62  ;;  %v653_v6 = vperm.slane %v649_v58, %v3641_v13 }
 0x1e1   : > { %v641_v11 = vrot.slane %v640_v3, 4  ;;  %v659_v15 = vperm.slane %v655_v9, %v3641_v13 }
 0x1e2   : > { %v524_v17 = vpack.i.b16 %v523_v7, %v522_v4  ;;  %v587_v18 = vperm.slane %v521_v5, %v3641_v13 }
 0x1e3   : > { %v642_v20 = vsel %vm536_vm8, %v641_v11, %v634_v10  ;;  %v660_v21 = vrot.slane %v659_v15, 4 }
 0x1e4   : > { %v588_v14 = vrot.slane %v587_v18, 4  ;;  %v591_v22 = vsel %vm536_vm8, %v587_v18, %v590_v16  ;;  %v613_v23 = vperm.slane %v524_v17, %v3641_v13  ;;  %v646_v24 = vperm.slane %v642_v20, %v3647_v26 }
 0x1e5   : > { %v599_v25 = vperm.slane %v591_v22, %v3647_v26  ;;  %v661_v27 = vsel %vm536_vm8, %v660_v21, %v653_v6 }
 0x1e6   : > { %v589_v28 = vsel %vm536_vm8, %v588_v14, %v582_v61  ;;  %v614_v29 = vrot.slane %v613_v23, 4  ;;  %v617_v31 = vsel %vm536_vm8, %v613_v23, %v616_v19  ;;  %v665_v32 = vperm.slane %v661_v27, %v3647_v26 }
 0x1e7   : > { %v595_v33 = vperm.slane %v589_v28, %v3647_v26  ;;  %v602_v34 = vrot.slane %v599_v25, 4  ;;  %v625_v35 = vperm.slane %v617_v31, %v3647_v26  ;;  %v709_v38 = vshrl.u32 %v646_v24, 16 }
 0x1e8   : > { %v615_v36 = vsel %vm536_vm8, %v614_v29, %v608_v63  ;;  %988 = vrot.lane.b32.xlu1 %v3639_v12, %s3396_s9  ;;  %990 = vrot.lane.b32.xlu2 %v3635_v8, %s3395_s8  ;;  %v708_v37 = vpack.i.b16 %v665_v32, %v646_v24  ;;  %v710_v39 = vshrl.u32 %v665_v32, 16  ;;  %v647_v55 = vrot.slane %v646_v24, 4 }
 0x1e9   : > { %v600_v40 = vrot.slane %v595_v33, 4  ;;  %v603_v41 = vsel %vm536_vm8, 0, %v602_v34  ;;  %v621_v42 = vperm.slane %v615_v36, %v3647_v26  ;;  %v628_v43 = vrot.slane %v625_v35, 4 }
 0x1ea   : > { %v668_v44 = vsel %vm536_vm8, %v602_v34, %v595_v33  ;;  %v673_v45 = vrot.slane %v603_v41, 4  ;;  %v711_v46 = vpack.i.b16 %v710_v39, %v709_v38  ;;  %v666_v57 = vrot.slane %v665_v32, 4 }
 0x1eb   : > { %v601_v47 = vsel %vm536_vm8, 0, %v600_v40  ;;  %v626_v48 = vrot.slane %v621_v42, 4  ;;  %v629_v49 = vsel %vm536_vm8, 0, %v628_v43  ;;  %v687_v52 = vsel %vm536_vm8, %v628_v43, %v621_v42  ;;  %v731_v40 = vpop.permute.xlu2 %730 }
 0x1ec   : > { %v692_v50 = vrot.slane %v629_v49, 4  ;;  %v674_v51 = vsel %vm536_vm8, %v673_v45, %v601_v47  ;;  %v672_v58 = vperm.slane %v668_v44, %v3641_v13  ;;  %v648_v61 = vsel %vm536_vm8, 0, %v647_v55 }
 0x1ed   : > { %v627_v53 = vsel %vm536_vm8, 0, %v626_v48  ;;  %v678_v54 = vperm.slane %v674_v51, %v3641_v13  ;;  %v691_v62 = vperm.slane %v687_v52, %v3641_v13  ;;  %v667_v63 = vsel %vm536_vm8, 0, %v666_v57 }
 0x1ee   : > { %v693_v56 = vsel %vm536_vm8, %v692_v50, %v627_v53  ;;  %v715_v1 = vshrl.u32 %v648_v61, 16  ;;  %v714_v5 = vpack.i.b16 %v667_v63, %v648_v61  ;;  %v716_v7 = vshrl.u32 %v667_v63, 16 }
 0x1ef   : > { %v679_v59 = vrot.slane %v678_v54, 4  ;;  %v697_v60 = vperm.slane %v693_v56, %v3641_v13  ;;  %v1256_v21 = vunpack.c.l.b16 %v708_v37  ;;  %v1283_v29 = vunpack.c.l.b16 %v711_v46  ;;  %v733_v46 = vpop.permute.xlu1 %732 }
 0x1f0   : > { %994 = vrot.lane.b32.xlu1 %v3635_v8, %s3394_s7  ;;  %996 = vrot.lane.b32.xlu2 %v3639_v12, %s3394_s7  ;;  %v717_v11 = vpack.i.b16 %v716_v7, %v715_v1  ;;  %v1309_v32 = vunpack.c.l.b16 %v714_v5  ;;  %v749_v51 = vshrl.u32 %v731_v40, 16 }
 0x1f1   : > { %v680_v3 = vsel %vm536_vm8, %v679_v59, %v672_v58  ;;  %v698_v4 = vrot.slane %v697_v60, 4  ;;  %v761_v59 = vshrl.u32 %v733_v46, 16  ;;  %v1001_v60 = vshrl.u32 %v3635_v8, 16 }
 0x1f2   : > { %v684_v9 = vperm.slane %v680_v3, %v3647_v26  ;;  %v1335_v38 = vunpack.c.l.b16 %v717_v11 }
 0x1f3   : > { %v699_v10 = vsel %vm536_vm8, %v698_v4, %v691_v62 }
 0x1f4   : > { %v703_v15 = vperm.slane %v699_v10, %v3647_v26  ;;  %v685_v16 = vrot.slane %v684_v9, 4  ;;  %v721_v17 = vshrl.u32 %v684_v9, 16 }
 0x1f6   : > { %v720_v18 = vpack.i.b16 %v703_v15, %v684_v9  ;;  %v722_v19 = vshrl.u32 %v703_v15, 16  ;;  %v686_v20 = vsel %vm536_vm8, 0, %v685_v16  ;;  %v704_v6 = vrot.slane %v703_v15, 4 }
 0x1f7   : > { %v727_v25 = vshrl.u32 %v686_v20, 16 }
 0x1f8   : > { %v1257_v14 = vunpack.c.l.b16 %v720_v18  ;;  %v723_v22 = vpack.i.b16 %v722_v19, %v721_v17  ;;  %v705_v23 = vsel %vm536_vm8, 0, %v704_v6  ;;  %v1013_v19 = vshrl.u32 %v3639_v12, 16 }
 0x1f9   : > { %v726_v24 = vpack.i.b16 %v705_v23, %v686_v20  ;;  %v728_v27 = vshrl.u32 %v705_v23, 16 }
 0x1fa   : > { %v3724_v28 = vpack.c.b16 %v1257_v14, %v1256_v21  ;;  %v1284_v31 = vunpack.c.l.b16 %v723_v22 }
 0x1fb   : > { %v1310_v33 = vunpack.c.l.b16 %v726_v24  ;;  %v729_v34 = vpack.i.b16 %v728_v27, %v727_v25 }
 0x1fc   : > { %v3726_v35 = vpack.c.b16 %v1284_v31, %v1283_v29 }
 0x1fd   : > { %v3728_v36 = vpack.c.b16 %v1310_v33, %v1309_v32  ;;  %v1336_v37 = vunpack.c.l.b16 %v729_v34 }
 0x1ff   : > { %v3730_v39 = vpack.c.b16 %v1336_v37, %v1335_v38 }
 0x22a   : > { %v735_v41 = vpop.permute.xlu2 %734 }
 0x22b   : > { %v750_v48 = vshrl.u32 %v735_v41, 16  ;;  %v748_v53 = vpack.i.b16 %v735_v41, %v731_v40 }
 0x22d   : > { %v751_v54 = vpack.i.b16 %v750_v48, %v749_v51  ;;  %v774_v63 = vperm.slane %v748_v53, %v3641_v13 }
 0x22f   : > { %v3740_v5 = vperm.slane %v751_v54, %v3641_v13  ;;  %v782_v20 = vrot.slane %v774_v63, 4 }
 0x231   : > { %v741_v43 = vpop.permute.xlu0 %740  ;;  %v808_v25 = vrot.slane %v3740_v5, 4 }
 0x232   : > { %v3732_v42 = vpop.permute.xlu2 %738  ;;  %v767_v52 = vshrl.u32 %v741_v43, 16 }
 0x233   : > { %v755_v27 = vshrl.u32 %v3732_v42, 16 }
 0x239   : > { %v987_v45 = vpop.permute.xlu0 %986 }
 0x23a   : > { %v745_v44 = vpop.permute.xlu2 %744  ;;  %v1002_v55 = vshrl.u32 %v987_v45, 16  ;;  %v1000_v7 = vpack.i.b16 %v987_v45, %v3635_v8 }
 0x23b   : > { %v768_v49 = vshrl.u32 %v745_v44, 16  ;;  %v766_v50 = vpack.i.b16 %v745_v44, %v741_v43 }
 0x23c   : > { %v1003_v9 = vpack.i.b16 %v1002_v55, %v1001_v60  ;;  %v3748_v22 = vperm.slane %v1000_v7, %v3641_v13 }
 0x23d   : > { %v769_v56 = vpack.i.b16 %v768_v49, %v767_v52  ;;  %v831_v57 = vperm.slane %v766_v50, %v3641_v13 }
 0x23e   : > { %v3755_v29 = vperm.slane %v1003_v9, %v3641_v13  ;;  %v1034_v45 = vrot.slane %v3748_v22, 4 }
 0x23f   : > { %v857_v10 = vperm.slane %v769_v56, %v3641_v13  ;;  %v832_v11 = vrot.slane %v831_v57, 4 }
 0x240   : > { %v1060_v54 = vrot.slane %v3755_v29, 4 }
 0x241   : > { %v993_v58 = vpop.permute.xlu0 %992  ;;  %v858_v8 = vrot.slane %v857_v10, 4 }
 0x242   : > { %v3734_v47 = vpop.permute.xlu2 %990  ;;  %v1019_v15 = vshrl.u32 %v993_v58, 16 }
 0x243   : > { %v1007_v55 = vshrl.u32 %v3734_v47, 16 }
 0x24a   : > { %v997_v61 = vpop.permute.xlu2 %996  ;;  %v737_v62 = vpop.permute.xlu1 %736 }
 0x24b   : > { %v1020_v1 = vshrl.u32 %v997_v61, 16  ;;  %v760_v3 = vpack.i.b16 %v737_v62, %v733_v46  ;;  %v762_v4 = vshrl.u32 %v737_v62, 16  ;;  %v1018_v18 = vpack.i.b16 %v997_v61, %v993_v58 }
 0x24d   : > { %v763_v16 = vpack.i.b16 %v762_v4, %v761_v59  ;;  %v826_v17 = vperm.slane %v760_v3, %v3641_v13  ;;  %v1021_v6 = vpack.i.b16 %v1020_v1, %v1019_v15  ;;  %v3759_v32 = vperm.slane %v1018_v18, %v3641_v13 }
 0x24f   : > { %v833_v21 = vsel %vm536_vm8, %v832_v11, %v826_v17  ;;  %v834_v14 = vrot.slane %v826_v17, 4  ;;  %v852_v24 = vperm.slane %v763_v16, %v3641_v13  ;;  %v3764_v40 = vperm.slane %v1021_v6, %v3641_v13 }
 0x250   : > { %v839_v23 = vperm.slane %v833_v21, %v3647_v26 }
 0x251   : > { %v835_v31 = vsel %vm536_vm8, %v831_v57, %v834_v14  ;;  %v859_v34 = vsel %vm536_vm8, %v858_v8, %v852_v24  ;;  %v860_v38 = vrot.slane %v852_v24, 4  ;;  %v1084_v57 = vrot.slane %v3759_v32, 4 }
 0x252   : > { %v843_v33 = vperm.slane %v835_v31, %v3647_v26  ;;  %v743_v37 = vpop.permute.xlu1 %742  ;;  %v865_v41 = vperm.slane %v859_v34, %v3647_v26  ;;  %v844_v46 = vrot.slane %v839_v23, 4  ;;  %v1110_v58 = vrot.slane %v3764_v40, 4 }
 0x253   : > { %v754_v43 = vpack.i.b16 %v743_v37, %v3732_v42  ;;  %v756_v44 = vshrl.u32 %v743_v37, 16  ;;  %v861_v49 = vsel %vm536_vm8, %v857_v10, %v860_v38 }
 0x254   : > { %v846_v48 = vrot.slane %v843_v33, 4  ;;  %v869_v50 = vperm.slane %v861_v49, %v3647_v26  ;;  %v870_v51 = vrot.slane %v865_v41, 4  ;;  %v845_v61 = vsel %vm536_vm8, 0, %v844_v46 }
 0x255   : > { %v757_v52 = vpack.i.b16 %v756_v44, %v755_v27  ;;  %v779_v53 = vperm.slane %v754_v43, %v3641_v13 }
 0x256   : > { %v847_v56 = vsel %vm536_vm8, 0, %v846_v48  ;;  %v3776_v42 = vsel %vm536_vm8, %v846_v48, %v839_v23  ;;  %v872_v59 = vrot.slane %v869_v50, 4  ;;  %v3784_v4 = vsel %vm536_vm8, 0, %v870_v51 }
 0x257   : > { %v917_v60 = vrot.slane %v847_v56, 4  ;;  %v780_v62 = vrot.slane %v779_v53, 4  ;;  %v783_v1 = vsel %vm536_vm8, %v779_v53, %v782_v20  ;;  %v805_v3 = vperm.slane %v757_v52, %v3641_v13 }
 0x258   : > { %v3787_v7 = vsel %vm536_vm8, 0, %v872_v59  ;;  %v916_v9 = vperm.slane %v3776_v42, %v3641_v13  ;;  %v791_v10 = vperm.slane %v783_v1, %v3647_v26  ;;  %v3799_v8 = vsel %vm536_vm8, %v872_v59, %v865_v41 }
 0x259   : > { %v918_v11 = vsel %vm536_vm8, %v917_v60, %v845_v61  ;;  %v781_v15 = vsel %vm536_vm8, %v780_v62, %v774_v63  ;;  %v806_v16 = vrot.slane %v805_v3, 4  ;;  %v809_v17 = vsel %vm536_vm8, %v805_v3, %v808_v25 }
 0x25a   : > { %v989_v18 = vpop.permute.xlu1 %988  ;;  %v787_v20 = vperm.slane %v781_v15, %v3647_v26  ;;  %v794_v6 = vrot.slane %v791_v10, 4  ;;  %v817_v21 = vperm.slane %v809_v17, %v3647_v26  ;;  %v936_v23 = vrot.slane %v3787_v7, 4 }
 0x25b   : > { %v1012_v14 = vpack.i.b16 %v989_v18, %v3639_v12  ;;  %v807_v24 = vsel %vm536_vm8, %v806_v16, %v3740_v5  ;;  %v1014_v63 = vshrl.u32 %v989_v18, 16  ;;  %v922_v41 = vperm.slane %v918_v11, %v3641_v13 }
 0x25c   : > { %v792_v27 = vrot.slane %v787_v20, 4  ;;  %v795_v25 = vsel %vm536_vm8, 0, %v794_v6  ;;  %v813_v31 = vperm.slane %v807_v24, %v3647_v26  ;;  %v820_v33 = vrot.slane %v817_v21, 4 }
 0x25d   : > { %v879_v34 = vrot.slane %v795_v25, 4  ;;  %v1015_v38 = vpack.i.b16 %v1014_v63, %v1013_v19  ;;  %v1078_v37 = vperm.slane %v1012_v14, %v3641_v13  ;;  %v935_v46 = vperm.slane %v3799_v8, %v3641_v13 }
 0x25e   : > { %v793_v43 = vsel %vm536_vm8, 0, %v792_v27  ;;  %v818_v44 = vrot.slane %v813_v31, 4  ;;  %v821_v5 = vsel %vm536_vm8, 0, %v820_v33  ;;  %v874_v48 = vsel %vm536_vm8, %v794_v6, %v787_v20 }
 0x25f   : > { %v880_v49 = vsel %vm536_vm8, %v879_v34, %v793_v43  ;;  %v898_v50 = vrot.slane %v821_v5, 4  ;;  %v1085_v12 = vsel %vm536_vm8, %v1084_v57, %v1078_v37  ;;  %v1086_v51 = vrot.slane %v1078_v37, 4 }
 0x260   : > { %v819_v19 = vsel %vm536_vm8, 0, %v818_v44  ;;  %v1091_v52 = vperm.slane %v1085_v12, %v3647_v26  ;;  %v1104_v53 = vperm.slane %v1015_v38, %v3641_v13  ;;  %v893_v56 = vsel %vm536_vm8, %v820_v33, %v813_v31 }
 0x261   : > { %v884_v60 = vperm.slane %v880_v49, %v3641_v13  ;;  %v899_v61 = vsel %vm536_vm8, %v898_v50, %v819_v19  ;;  %v923_v62 = vrot.slane %v922_v41, 4  ;;  %v1087_v1 = vsel %vm536_vm8, %v3759_v32, %v1086_v51 }
 0x262   : > { %v995_v59 = vpop.permute.xlu1 %994  ;;  %v1096_v3 = vrot.slane %v1091_v52, 4  ;;  %v1111_v57 = vsel %vm536_vm8, %v1110_v58, %v1104_v53  ;;  %v1112_v10 = vrot.slane %v1104_v53, 4  ;;  %v1095_v11 = vperm.slane %v1087_v1, %v3647_v26 }
 0x263   : > { %v1117_v15 = vperm.slane %v1111_v57, %v3647_v26  ;;  %v1006_v16 = vpack.i.b16 %v995_v59, %v3734_v47  ;;  %v1008_v17 = vshrl.u32 %v995_v59, 16  ;;  %v878_v18 = vperm.slane %v874_v48, %v3641_v13 }
 0x264   : > { %v1113_v20 = vsel %vm536_vm8, %v3764_v40, %v1112_v10  ;;  %v885_v6 = vrot.slane %v884_v60, 4  ;;  %v903_v21 = vperm.slane %v899_v61, %v3641_v13  ;;  %v1098_v32 = vrot.slane %v1095_v11, 4 }
 0x265   : > { %v1121_v14 = vperm.slane %v1113_v20, %v3647_v26  ;;  %v1122_v58 = vrot.slane %v1117_v15, 4  ;;  %v1009_v24 = vpack.i.b16 %v1008_v17, %v1007_v55  ;;  %v1097_v63 = vsel %vm536_vm8, 0, %v1096_v3 }
 0x266   : > { %v1031_v27 = vperm.slane %v1006_v16, %v3641_v13  ;;  %v886_v25 = vsel %vm536_vm8, %v885_v6, %v878_v18  ;;  %v897_v31 = vperm.slane %v893_v56, %v3641_v13  ;;  %v1099_v40 = vsel %vm536_vm8, 0, %v1098_v32 }
 0x267   : > { %v1124_v33 = vrot.slane %v1121_v14, 4  ;;  %v904_v34 = vrot.slane %v903_v21, 4  ;;  %v924_v38 = vsel %vm536_vm8, %v923_v62, %v916_v9  ;;  %v3846_v47 = vsel %vm536_vm8, 0, %v1122_v58 }
 0x268   : > { %v1169_v55 = vrot.slane %v1099_v40, 4  ;;  %v1032_v37 = vrot.slane %v1031_v27, 4  ;;  %v1035_v41 = vsel %vm536_vm8, %v1031_v27, %v1034_v45  ;;  %v3855_v44 = vsel %vm536_vm8, %v1098_v32, %v1091_v52 }
 0x269   : > { %v3852_v43 = vsel %vm536_vm8, 0, %v1124_v33  ;;  %v1043_v5 = vperm.slane %v1035_v41, %v3647_v26  ;;  %v1057_v42 = vperm.slane %v1009_v24, %v3641_v13  ;;  %v3863_v48 = vsel %vm536_vm8, %v1124_v33, %v1117_v15 }
 0x26a   : > { %v3860_v9 = vsel %vm536_vm8, %v1169_v55, %v1097_v63  ;;  %v1188_v49 = vrot.slane %v3852_v43, 4  ;;  %v1033_v45 = vsel %vm536_vm8, %v1032_v37, %v3748_v22  ;;  %v890_v53 = vperm.slane %v886_v25, %v3647_v26 }
 0x26b   : > { %v1039_v50 = vperm.slane %v1033_v45, %v3647_v26  ;;  %v1046_v12 = vrot.slane %v1043_v5, 4  ;;  %v1058_v19 = vrot.slane %v1057_v42, 4  ;;  %v1061_v51 = vsel %vm536_vm8, %v1057_v42, %v1060_v54 }
 0x26c   : > { %v1069_v52 = vperm.slane %v1061_v51, %v3647_v26  ;;  %v905_v56 = vsel %vm536_vm8, %v904_v34, %v897_v31  ;;  %v937_v22 = vsel %vm536_vm8, %v936_v23, %v3784_v4  ;;  %v928_v57 = vperm.slane %v924_v38, %v3647_v26 }
 0x26d   : > { %v1044_v59 = vrot.slane %v1039_v50, 4  ;;  %v1047_v60 = vsel %vm536_vm8, 0, %v1046_v12  ;;  %v1059_v61 = vsel %vm536_vm8, %v1058_v19, %v3755_v29  ;;  %v1126_v54 = vsel %vm536_vm8, %v1046_v12, %v1039_v50 }
 0x26e   : > { %v1065_v62 = vperm.slane %v1059_v61, %v3647_v26  ;;  %v1072_v1 = vrot.slane %v1069_v52, 4  ;;  %v1131_v3 = vrot.slane %v1047_v60, 4  ;;  %v1130_v7 = vperm.slane %v1126_v54, %v3641_v13 }
 0x26f   : > { %v1045_v10 = vsel %vm536_vm8, 0, %v1044_v59  ;;  %v909_v4 = vperm.slane %v905_v56, %v3647_v26  ;;  %v941_v23 = vperm.slane %v937_v22, %v3641_v13  ;;  %v954_v6 = vshrl.u32 %v890_v53, 16 }
 0x270   : > { %v1070_v11 = vrot.slane %v1065_v62, 4  ;;  %v1073_v29 = vsel %vm536_vm8, 0, %v1072_v1  ;;  %v1132_v15 = vsel %vm536_vm8, %v1131_v3, %v1045_v10  ;;  %v3893_v16 = vsel %vm536_vm8, %v1072_v1, %v1065_v62 }
 0x271   : > { %v1150_v17 = vrot.slane %v1073_v29, 4  ;;  %v942_v18 = vrot.slane %v941_v23, 4  ;;  %v952_v20 = vpack.i.b16 %v909_v4, %v890_v53  ;;  %v955_v32 = vshrl.u32 %v909_v4, 16 }
 0x272   : > { %v1071_v21 = vsel %vm536_vm8, 0, %v1070_v11  ;;  %v970_v14 = vshrl.u32 %v928_v57, 16  ;;  %v891_v58 = vrot.slane %v890_v53, 4  ;;  %v910_v27 = vrot.slane %v909_v4, 4 }
 0x273   : > { %v943_v24 = vsel %vm536_vm8, %v942_v18, %v935_v46  ;;  %1238 = vst.msk [vmem:[%s3902_s11] sm:$0xf] %vm1237_vm9, %v952_v20  ;;  %v1259_v63 = vunpack.c.l.b16 %v952_v20  ;;  %v929_v25 = vrot.slane %v928_v57, 4  ;;  %v956_v40 = vpack.i.b16 %v955_v32, %v954_v6 }
 0x274   : > { %v947_v31 = vperm.slane %v943_v24, %v3647_v26  ;;  %v892_v33 = vsel %vm536_vm8, 0, %v891_v58  ;;  %v1136_v8 = vperm.slane %v1132_v15, %v3641_v13  ;;  %v911_v46 = vsel %vm536_vm8, 0, %v910_v27 }
 0x275   : > { %v930_v34 = vsel %vm536_vm8, 0, %v929_v25  ;;  %v962_v38 = vshrl.u32 %v892_v33, 16  ;;  %v1149_v55 = vperm.slane %v3893_v16, %v3641_v13  ;;  %1240 = vst.msk [vmem:[%s3902_s11 + $0x8] sm:$0xf] %vm1237_vm9, %v956_v40  ;;  %v1286_v5 = vunpack.c.l.b16 %v956_v40 }
 0x276   : > { %v968_v37 = vpack.i.b16 %v947_v31, %v928_v57  ;;  %v971_v41 = vshrl.u32 %v947_v31, 16  ;;  %v948_v42 = vrot.slane %v947_v31, 4  ;;  %v960_v45 = vpack.i.b16 %v911_v46, %v892_v33 }
 0x277   : > { %v963_v50 = vshrl.u32 %v911_v46, 16  ;;  %v978_v12 = vshrl.u32 %v930_v34, 16  ;;  %v1137_v19 = vrot.slane %v1136_v8, 4  ;;  %v1151_v56 = vsel %vm536_vm8, %v1150_v17, %v1071_v21 }
 0x278   : > { %1239 = vst.msk [vmem:[%s3902_s11 + $0x4] sm:$0xf] %vm1237_vm9, %v968_v37  ;;  %v1260_v51 = vunpack.c.l.b16 %v968_v37  ;;  %v972_v52 = vpack.i.b16 %v971_v41, %v970_v14  ;;  %v949_v53 = vsel %vm536_vm8, 0, %v948_v42  ;;  %v1312_v59 = vunpack.c.l.b16 %v960_v45 }
 0x279   : > { %v976_v22 = vpack.i.b16 %v949_v53, %v930_v34  ;;  %1242 = vst.msk [vmem:[%s3902_s11 + $0x10] sm:$0xf] %vm1237_vm9, %v960_v45  ;;  %v964_v60 = vpack.i.b16 %v963_v50, %v962_v38  ;;  %v979_v61 = vshrl.u32 %v949_v53, 16  ;;  %v1138_v1 = vsel %vm536_vm8, %v1137_v19, %v1130_v7 }
 0x27a   : > { %v1261_v54 = vpack.c.b16 %v1260_v51, %v1259_v63  ;;  %1241 = vst.msk [vmem:[%s3902_s11 + $0xc] sm:$0xf] %vm1237_vm9, %v972_v52  ;;  %v1287_v62 = vunpack.c.l.b16 %v972_v52  ;;  %v1155_v3 = vperm.slane %v1151_v56, %v3641_v13  ;;  %v1142_v23 = vperm.slane %v1138_v1, %v3647_v26 }
 0x27b   : > { %1243 = vst.msk [vmem:[%s3902_s11 + $0x14] sm:$0xf] %vm1237_vm9, %v976_v22  ;;  %v1313_v57 = vunpack.c.l.b16 %v976_v22  ;;  %v980_v10 = vpack.i.b16 %v979_v61, %v978_v12  ;;  %v1338_v4 = vunpack.c.l.b16 %v964_v60  ;;  %v1174_v16 = vperm.slane %v3860_v9, %v3641_v13 }
 0x27c   : > { %v1267_v11 = vsel %vm1262_vm10, %v1261_v54, 0  ;;  %v1288_v29 = vpack.c.b16 %v1287_v62, %v1286_v5  ;;  %1244 = vst.msk [vmem:[%s3902_s11 + $0x18] sm:$0xf] %vm1237_vm9, %v964_v60  ;;  %v1156_v15 = vrot.slane %v1155_v3, 4  ;;  %v1168_v7 = vperm.slane %v3855_v44, %v3641_v13 }
 0x27d   : > { %1276 = vmatpush.bf16.xpose.msra.mxu2 %v1267_v11  ;;  %v1314_v17 = vpack.c.b16 %v1313_v57, %v1312_v59  ;;  %1245 = vst.msk [vmem:[%s3902_s11 + $0x1c] sm:$0xf] %vm1237_vm9, %v980_v10  ;;  %v1339_v18 = vunpack.c.l.b16 %v980_v10  ;;  %v1189_v20 = vsel %vm536_vm8, %v1188_v49, %v3846_v47  ;;  %v1175_v32 = vrot.slane %v1174_v16, 4 }
 0x27e   : > { %v1293_v6 = vsel %vm1262_vm10, %v1288_v29, 0  ;;  %v1157_v21 = vsel %vm536_vm8, %v1156_v15, %v1149_v55  ;;  %v1193_v9 = vperm.slane %v1189_v20, %v3641_v13  ;;  %v1187_v24 = vperm.slane %v3863_v48, %v3641_v13 }
 0x27f   : > { %1302 = vmatpush.bf16.xpose.msra.mxu3 %v1293_v6  ;;  %v1319_v44 = vsel %vm1262_vm10, %v1314_v17, 0  ;;  %v1340_v14 = vpack.c.b16 %v1339_v18, %v1338_v4  ;;  %v1161_v58 = vperm.slane %v1157_v21, %v3647_v26  ;;  %v1176_v47 = vsel %vm536_vm8, %v1175_v32, %v1168_v7 }
 0x280   : > { %v1194_v43 = vrot.slane %v1193_v9, 4  ;;  %v1206_v49 = vshrl.u32 %v1142_v23, 16  ;;  %v1143_v63 = vrot.slane %v1142_v23, 4  ;;  %v1180_v25 = vperm.slane %v1176_v47, %v3647_v26 }
 0x281   : > { %v1345_v27 = vsel %vm1262_vm10, %v1340_v14, 0  ;;  %v1204_v31 = vpack.i.b16 %v1161_v58, %v1142_v23  ;;  %v1207_v40 = vshrl.u32 %v1161_v58, 16  ;;  %v1162_v46 = vrot.slane %v1161_v58, 4 }
 0x282   : > { %v1195_v33 = vsel %vm536_vm8, %v1194_v43, %v1187_v24  ;;  %v1144_v8 = vsel %vm536_vm8, 0, %v1143_v63  ;;  %v1222_v55 = vshrl.u32 %v1180_v25, 16  ;;  %v1181_v41 = vrot.slane %v1180_v25, 4 }
 0x283   : > { %v1199_v48 = vperm.slane %v1195_v33, %v3647_v26  ;;  %1248 = vst.msk [vmem:[%s3956_s18] sm:$0xf] %vm1237_vm9, %v1204_v31  ;;  %v1208_v34 = vpack.i.b16 %v1207_v40, %v1206_v49  ;;  %v1482_v38 = vunpack.c.l.b16 %v1204_v31  ;;  %v1163_v37 = vsel %vm536_vm8, 0, %v1162_v46 }
 0x284   : > { %2777 = vmatmul.msk.bf16.vlgmr.msra.gmra.mxu2 %vm1262_vm10, %v3724_v28  ;;  %v1214_v50 = vshrl.u32 %v1144_v8, 16  ;;  %v1182_v19 = vsel %vm536_vm8, 0, %v1181_v41  ;;  %v1212_v51 = vpack.i.b16 %v1163_v37, %v1144_v8  ;;  %v1215_v52 = vshrl.u32 %v1163_v37, 16 }
 0x285   : > { %1328 = vmatpush.bf16.xpose.msrb.mxu2 %v1319_v44  ;;  %v1220_v5 = vpack.i.b16 %v1199_v48, %v1180_v25  ;;  %v1223_v42 = vshrl.u32 %v1199_v48, 16  ;;  %1250 = vst.msk [vmem:[%s3956_s18 + $0x8] sm:$0xf] %vm1237_vm9, %v1208_v34  ;;  %v1200_v45 = vrot.slane %v1199_v48, 4  ;;  %v1508_v12 = vunpack.c.l.b16 %v1208_v34 }
 0x286   : > { %2778 = vmatmul.msk.bf16.vlgmr.msra.gmra.mxu3 %vm1262_vm10, %v3726_v35  ;;  %v1230_v59 = vshrl.u32 %v1182_v19, 16  ;;  %1252 = vst.msk [vmem:[%s3956_s18 + $0x10] sm:$0xf] %vm1237_vm9, %v1212_v51  ;;  %v1534_v61 = vunpack.c.l.b16 %v1212_v51  ;;  %v1216_v54 = vpack.i.b16 %v1215_v52, %v1214_v50  ;;  %v1361_v16 = vlaneseq }
 0x287   : > { %1354 = vmatpush.bf16.xpose.msrb.mxu3 %v1345_v27  ;;  %1249 = vst.msk [vmem:[%s3956_s18 + $0x4] sm:$0xf] %vm1237_vm9, %v1220_v5  ;;  %v1483_v53 = vunpack.c.l.b16 %v1220_v5  ;;  %v1224_v56 = vpack.i.b16 %v1223_v42, %v1222_v55  ;;  %v1201_v22 = vsel %vm536_vm8, 0, %v1200_v45 }
 0x288   : > { %v1228_v60 = vpack.i.b16 %v1201_v22, %v1182_v19  ;;  %v1231_v62 = vshrl.u32 %v1201_v22, 16  ;;  %v1560_v4 = vunpack.c.l.b16 %v1216_v54  ;;  %1254 = vst.msk [vmem:[%s3956_s18 + $0x18] sm:$0xf] %vm1237_vm9, %v1216_v54  ;;  %v1362_v7 = vshrl.u32 %v1361_v16, 7 }
 0x289   : > { %v1484_v1 = vpack.c.b16 %v1483_v53, %v1482_v38  ;;  %1251 = vst.msk [vmem:[%s3956_s18 + $0xc] sm:$0xf] %vm1237_vm9, %v1224_v56  ;;  %v1509_v3 = vunpack.c.l.b16 %v1224_v56  ;;  %v1365_v17 = vand.u32 127, %v1361_v16 }
 0x28a   : > { %1253 = vst.msk [vmem:[%s3956_s18 + $0x14] sm:$0xf] %vm1237_vm9, %v1228_v60  ;;  %v1535_v57 = vunpack.c.l.b16 %v1228_v60  ;;  %v1232_v10 = vpack.i.b16 %v1231_v62, %v1230_v59  ;;  %v1363_v43 = vadd.s32 8, %v1362_v7 }
 0x28b   : > { %1496 = vmatpush.bf16.msrb.mxu0 %v1484_v1  ;;  %v1510_v23 = vpack.c.b16 %v1509_v3, %v1508_v12  ;;  %vm1366_vm11 = vcmp.le.s32.totalorder %v1365_v17, %v1362_v7 }
 0x28c   : > { %v1536_v11 = vpack.c.b16 %v1535_v57, %v1534_v61  ;;  %1255 = vst.msk [vmem:[%s3956_s18 + $0x1c] sm:$0xf] %vm1237_vm9, %v1232_v10  ;;  %v1561_v29 = vunpack.c.l.b16 %v1232_v10  ;;  %vm1367_vm12 = vcmp.le.s32.totalorder %v1365_v17, %v1363_v43 }
 0x28d   : > { %1522 = vmatpush.bf16.msrb.mxu1 %v1510_v23 }
 0x28e   : > { %1548 = vmatpush.bf16.msra.mxu2 %v1536_v11  ;;  %v1562_v15 = vpack.c.b16 %v1561_v29, %v1560_v4 }
 0x290   : > { %1574 = vmatpush.bf16.msra.mxu3 %v1562_v15 }
 0x294   : > { %2779 = vmatmul.msk.bf16.vlgmr.msrb.gmra.mxu2 %vm1262_vm10, %v3728_v36 }
 0x296   : > { %2780 = vmatmul.msk.bf16.vlgmr.msrb.gmra.mxu3 %vm1262_vm10, %v3730_v39 }
 0x307   : > { %v1278_v18 = vpop.f32.mrf.mxu2 }
 0x308   : > { %v1372_v20 = vsel %vm1366_vm11, %v1278_v18, -1e+30 }
 0x309   : > { %v1304_v6 = vpop.f32.mrf.mxu3  ;;  %v1380_v21 = vsel %vm1262_vm10, %v1372_v20, -inf }
 0x30a   : > { %1381 = vmax.xlane.f32.xlu2 %v1380_v21  ;;  %v1374_v34 = vsel %vm1366_vm11, %v1304_v6, -1e+30 }
 0x30b   : > { %v1386_v55 = vsel %vm1262_vm10, %v1374_v34, -inf }
 0x30f   : > { %v1280_v32 = vpop.f32.mrf.mxu2 }
 0x310   : > { %v1373_v48 = vsel %vm1367_vm12, %v1280_v32, -1e+30 }
 0x311   : > { %v1306_v9 = vpop.f32.mrf.mxu3  ;;  %v1383_v38 = vsel %vm1262_vm10, %v1373_v48, -inf }
 0x312   : > { %v1375_v27 = vsel %vm1367_vm12, %v1306_v9, -1e+30 }
 0x313   : > { %v1389_v8 = vsel %vm1262_vm10, %v1375_v27, -inf }
 0x317   : > { %v1330_v44 = vpop.f32.mrf.mxu2 }
 0x318   : > { %v1376_v14 = vsel %vm1366_vm11, %v1330_v44, -1e+30 }
 0x319   : > { %v1356_v58 = vpop.f32.mrf.mxu3  ;;  %v1392_v24 = vsel %vm1262_vm10, %v1376_v14, -inf }
 0x31a   : > { %v1378_v47 = vsel %vm1366_vm11, %v1356_v58, -1e+30  ;;  %1393 = vmax.xlane.f32.xlu0 %v1392_v24 }
 0x31b   : > { %v1398_v49 = vsel %vm1262_vm10, %v1378_v47, -inf }
 0x31c   : > { %1399 = vmax.xlane.f32.xlu2 %v1398_v49 }
 0x31f   : > { %v1332_v63 = vpop.f32.mrf.mxu2 }
 0x320   : > { %v1377_v25 = vsel %vm1367_vm12, %v1332_v63, -1e+30 }
 0x321   : > { %v1358_v31 = vpop.f32.mrf.mxu3  ;;  %v1395_v40 = vsel %vm1262_vm10, %v1377_v25, -inf }
 0x322   : > { %v1379_v33 = vsel %vm1367_vm12, %v1358_v31, -1e+30  ;;  %1396 = vmax.xlane.f32.xlu1 %v1395_v40 }
 0x323   : > { %v1401_v46 = vsel %vm1262_vm10, %v1379_v33, -inf }
 0x324   : > { %1390 = vmax.xlane.f32.xlu2 %v1389_v8  ;;  %1402 = vmax.xlane.f32.xlu0 %v1401_v46 }
 0x32a   : > { %1384 = vmax.xlane.f32.xlu1 %v1383_v38 }
 0x32c   : > { %1387 = vmax.xlane.f32.xlu0 %v1386_v55 }
 0x37d   : > { %v1382_v37 = vpop.xlane.xlu2 %1381 }
 0x37e   : > { %v1404_v41 = vsub.f32 %v1372_v20, %v1382_v37  ;;  %1429 = vst.msk [vmem:[#allocation4] sm:$0xff] %vm1428_vm13, %v1382_v37 }
 0x380   : > { %v1412_v5 = vmul.f32 1.442695, %v1404_v41 }
 0x382   : > { %3028 = vpow2.f32 %v1412_v5 }
 0x388   : > { %v3998_v42 = vpop.eup %3028 }
 0x389   : > { %v1437_v45 = vsel %vm1262_vm10, %v3998_v42, 0.0  ;;  %v1469_v24 = vpack.c.bf16 %v3998_v42, %v3998_v42 }
 0x38a   : > { %1438 = vadd.xlane.f32.xlu1 %v1437_v45 }
 0x38d   : > { %v1394_v50 = vpop.xlane.xlu0 %1393 }
 0x38e   : > { %v1408_v12 = vsub.f32 %v1376_v14, %v1394_v50  ;;  %1433 = vst.msk [vmem:[#allocation4 + $0x20] sm:$0xff] %vm1428_vm13, %v1394_v50 }
 0x38f   : > { %v1400_v19 = vpop.xlane.xlu2 %1399 }
 0x390   : > { %1435 = vst.msk [vmem:[#allocation4 + $0x30] sm:$0xff] %vm1428_vm13, %v1400_v19  ;;  %v1410_v51 = vsub.f32 %v1378_v47, %v1400_v19  ;;  %v1420_v52 = vmul.f32 1.442695, %v1408_v12 }
 0x392   : > { %v1424_v53 = vmul.f32 1.442695, %v1410_v51  ;;  %3030 = vpow2.f32 %v1420_v52 }
 0x394   : > { %3032 = vpow2.f32 %v1424_v53 }
 0x395   : > { %v1397_v56 = vpop.xlane.xlu1 %1396 }
 0x396   : > { %v1409_v22 = vsub.f32 %v1377_v25, %v1397_v56  ;;  %1434 = vst.msk [vmem:[#allocation4 + $0x28] sm:$0xff] %vm1428_vm13, %v1397_v56 }
 0x397   : > { %v1391_v59 = vpop.xlane.xlu2 %1390  ;;  %v1403_v60 = vpop.xlane.xlu0 %1402 }
 0x398   : > { %v1422_v61 = vmul.f32 1.442695, %v1409_v22  ;;  %v1407_v54 = vsub.f32 %v1375_v27, %v1391_v59  ;;  %1432 = vst.msk [vmem:[#allocation4 + $0x18] sm:$0xff] %vm1428_vm13, %v1391_v59  ;;  %v1411_v62 = vsub.f32 %v1379_v33, %v1403_v60  ;;  %v3031_v57 = vpop.eup %3030  ;;  %v1479_v33 = vunpack.c.l.b16 %v1469_v24 }
 0x399   : > { %1436 = vst.msk [vmem:[#allocation4 + $0x38] sm:$0xff] %vm1428_vm13, %v1403_v60  ;;  %v1473_v11 = vpack.c.bf16 %v3031_v57, %v3031_v57  ;;  %v1449_v5 = vsel %vm1262_vm10, %v3031_v57, 0.0 }
 0x39a   : > { %3034 = vpow2.f32 %v1422_v61  ;;  %v1418_v1 = vmul.f32 1.442695, %v1407_v54  ;;  %v1426_v3 = vmul.f32 1.442695, %v1411_v62  ;;  %v3033_v23 = vpop.eup %3032 }
 0x39b   : > { %v1475_v20 = vpack.c.bf16 %v3033_v23, %v3033_v23  ;;  %v1531_v32 = vunpack.c.l.b16 %v1473_v11 }
 0x39c   : > { %3036 = vpow2.f32 %v1418_v1 }
 0x39d   : > { %3038 = vpow2.f32 %v1426_v3  ;;  %v1385_v10 = vpop.xlane.xlu1 %1384  ;;  %v1557_v47 = vunpack.c.l.b16 %v1475_v20 }
 0x39e   : > { %v1405_v4 = vsub.f32 %v1373_v48, %v1385_v10  ;;  %1430 = vst.msk [vmem:[#allocation4 + $0x8] sm:$0xff] %vm1428_vm13, %v1385_v10  ;;  %v1455_v48 = vsel %vm1262_vm10, %v3033_v23, 0.0 }
 0x39f   : > { %v1388_v29 = vpop.xlane.xlu0 %1387 }
 0x3a0   : > { %v3035_v15 = vpop.eup %3034  ;;  %v1414_v16 = vmul.f32 1.442695, %v1405_v4  ;;  %v1406_v7 = vsub.f32 %v1374_v34, %v1388_v29  ;;  %1431 = vst.msk [vmem:[#allocation4 + $0x10] sm:$0xff] %vm1428_vm13, %v1388_v29 }
 0x3a1   : > { %v1474_v17 = vpack.c.bf16 %v3035_v15, %v3035_v15  ;;  %v1452_v42 = vsel %vm1262_vm10, %v3035_v15, 0.0 }
 0x3a2   : > { %v3037_v18 = vpop.eup %3036  ;;  %3040 = vpow2.f32 %v1414_v16  ;;  %v1416_v6 = vmul.f32 1.442695, %v1406_v7 }
 0x3a3   : > { %v3039_v21 = vpop.eup %3038  ;;  %v1532_v9 = vunpack.c.l.b16 %v1474_v17  ;;  %v1446_v44 = vsel %vm1262_vm10, %v3037_v18, 0.0  ;;  %v1472_v27 = vpack.c.bf16 %v3037_v18, %v3037_v18 }
 0x3a4   : > { %v1476_v14 = vpack.c.bf16 %v3039_v21, %v3039_v21  ;;  %3042 = vpow2.f32 %v1416_v6  ;;  %1447 = vadd.xlane.f32.xlu1 %v1446_v44  ;;  %v1458_v45 = vsel %vm1262_vm10, %v3039_v21, 0.0 }
 0x3a5   : > { %v1533_v58 = vpack.c.b16 %v1532_v9, %v1531_v32  ;;  %v1506_v37 = vunpack.c.l.b16 %v1472_v27 }
 0x3a6   : > { %v1558_v43 = vunpack.c.l.b16 %v1476_v14 }
 0x3a7   : > { %2783 = vmatmul.msk.bf16.vlgmr.msra.gmra.mxu2 %vm1262_vm10, %v1533_v58 }
 0x3a8   : > { %v3041_v49 = vpop.eup %3040  ;;  %v1559_v63 = vpack.c.b16 %v1558_v43, %v1557_v47 }
 0x3a9   : > { %v1470_v25 = vpack.c.bf16 %v3041_v49, %v3041_v49  ;;  %v1440_v31 = vsel %vm1262_vm10, %v3041_v49, 0.0 }
 0x3aa   : > { %v3043_v40 = vpop.eup %3042  ;;  %2784 = vmatmul.msk.bf16.vlgmr.msra.gmra.mxu3 %vm1262_vm10, %v1559_v63  ;;  %1441 = vadd.xlane.f32.xlu0 %v1440_v31 }
 0x3ab   : > { %v1471_v8 = vpack.c.bf16 %v3043_v40, %v3043_v40  ;;  %v1443_v46 = vsel %vm1262_vm10, %v3043_v40, 0.0  ;;  %v1480_v34 = vunpack.c.l.b16 %v1470_v25 }
 0x3ac   : > { %1444 = vadd.xlane.f32.xlu2 %v1443_v46  ;;  %1456 = vadd.xlane.f32.xlu1 %v1455_v48 }
 0x3ad   : > { %v1481_v38 = vpack.c.b16 %v1480_v34, %v1479_v33  ;;  %v1505_v55 = vunpack.c.l.b16 %v1471_v8 }
 0x3af   : > { %2781 = vmatmul.msk.bf16.vlgmr.msrb.gmra.mxu0 %vm1262_vm10, %v1481_v38  ;;  %v1507_v41 = vpack.c.b16 %v1506_v37, %v1505_v55 }
 0x3b1   : > { %2782 = vmatmul.msk.bf16.vlgmr.msrb.gmra.mxu1 %vm1262_vm10, %v1507_v41 }
 0x3b2   : > { %1450 = vadd.xlane.f32.xlu0 %v1449_v5 }
 0x3b4   : > { %1453 = vadd.xlane.f32.xlu2 %v1452_v42 }
 0x3ba   : > { %1459 = vadd.xlane.f32.xlu0 %v1458_v45 }
 0x3fd   : > { %v1439_v50 = vpop.xlane.xlu1 %1438 }
 0x3fe   : > { %1461 = vst.msk [vmem:[#allocation5] sm:$0xff] %vm1428_vm13, %v1439_v50 }
 0x417   : > { %v1448_v12 = vpop.xlane.xlu1 %1447 }
 0x418   : > { %1464 = vst.msk [vmem:[#allocation5 + $0x18] sm:$0xff] %vm1428_vm13, %v1448_v12 }
 0x41d   : > { %v1442_v19 = vpop.xlane.xlu0 %1441 }
 0x41e   : > { %1462 = vst.msk [vmem:[#allocation5 + $0x8] sm:$0xff] %vm1428_vm13, %v1442_v19 }
 0x41f   : > { %v1445_v51 = vpop.xlane.xlu2 %1444  ;;  %v1457_v52 = vpop.xlane.xlu1 %1456 }
 0x420   : > { %1463 = vst.msk [vmem:[#allocation5 + $0x10] sm:$0xff] %vm1428_vm13, %v1445_v51 }
 0x421   : > { %1467 = vst.msk [vmem:[#allocation5 + $0x30] sm:$0xff] %vm1428_vm13, %v1457_v52 }
 0x425   : > { %v1451_v53 = vpop.xlane.xlu0 %1450 }
 0x426   : > { %1465 = vst.msk [vmem:[#allocation5 + $0x20] sm:$0xff] %vm1428_vm13, %v1451_v53 }
 0x427   : > { %v1454_v56 = vpop.xlane.xlu2 %1453 }
 0x428   : > { %1466 = vst.msk [vmem:[#allocation5 + $0x28] sm:$0xff] %vm1428_vm13, %v1454_v56 }
 0x42a   : > { %v1550_v22 = vpop.f32.mrf.mxu2 }
 0x42b   : > { %1585 = vst.msk [vmem:[#allocation6 + $0x20] sm:$0xff] %vm1262_vm10, %v1550_v22 }
 0x42c   : > { %v1498_v59 = vpop.f32.mrf.mxu0 }
 0x42d   : > { %1581 = vst.msk [vmem:[#allocation6] sm:$0xff] %vm1262_vm10, %v1498_v59  ;;  %v1576_v60 = vpop.f32.mrf.mxu3  ;;  %v1460_v61 = vpop.xlane.xlu0 %1459 }
 0x42e   : > { %1587 = vst.msk [vmem:[#allocation6 + $0x30] sm:$0xff] %vm1262_vm10, %v1576_v60  ;;  %v1524_v54 = vpop.f32.mrf.mxu1 }
 0x42f   : > { %1468 = vst.msk [vmem:[#allocation5 + $0x38] sm:$0xff] %vm1428_vm13, %v1460_v61 }
 0x430   : > { %1583 = vst.msk [vmem:[#allocation6 + $0x10] sm:$0xff] %vm1262_vm10, %v1524_v54 }
 0x432   : > { %v1552_v62 = vpop.f32.mrf.mxu2 }
 0x433   : > { %1586 = vst.msk [vmem:[#allocation6 + $0x28] sm:$0xff] %vm1262_vm10, %v1552_v62  ;;  %2648 = sbr.rel (%p2785_p1) target bundleno = 1628 (0x65c), region = 119 }
 0x434   : > { %v1500_v1 = vpop.f32.mrf.mxu0 }
 0x435   : > { %1582 = vst.msk [vmem:[#allocation6 + $0x8] sm:$0xff] %vm1262_vm10, %v1500_v1  ;;  %v1578_v3 = vpop.f32.mrf.mxu3 }
 0x436   : > { %1588 = vst.msk [vmem:[#allocation6 + $0x38] sm:$0xff] %vm1262_vm10, %v1578_v3  ;;  %v1526_v57 = vpop.f32.mrf.mxu1 }
 0x437   : > { %1584 = vst.msk [vmem:[#allocation6 + $0x18] sm:$0xff] %vm1262_vm10, %v1526_v57 }
 0x438 LB: >> { %s2866_s15 = sshll.u32 %s3384_s17, 5  ;;  %v3400_v25 = vmov 0   ;;  %v1696_v31 = vld [vmem:[#allocation4 + $0x10] sm:$0xff]  ;;  %v1694_v40 = vld [vmem:[#allocation4] sm:$0xff]  ;;  %v1695_v55 = vld [vmem:[#allocation4 + $0x8] sm:$0xff]  ;;  %s1592_s17 = sadd.s32 1, %s3384_s17   ;;  %s3384_s17 = sphi %s4047_s17, %s1592_s17  }
 0x439   : >> { %s1597_s30 = scalar_lea.vmem [#allocation2], %s2866_s15  ;;  %3046 = vset.pattern.permute.xlu1 %v3400_v25  ;;  %3044 = vset.pattern.permute.xlu2 %v3400_v25  ;;  %v4101_v34 = vld [vmem:[#allocation4 + $0x30] sm:$0xff]  ;;  %v1698_v38 = vld [vmem:[#allocation4 + $0x20] sm:$0xff]  ;;  %v1697_v51 = vld [vmem:[#allocation4 + $0x18] sm:$0xff]  ;;  %s1943_s19 = scalar_lea.vmem [#allocation3], %s2866_s15 }
 0x43a   : >> { %v2867_v10 = vld [vmem:[%s1597_s30] sm:$0xff]  ;;  %v2868_v4 = vld [vmem:[%s1597_s30 + $0x8] sm:$0xff]  ;;  %v2869_v23 = vld [vmem:[%s1597_s30 + $0x10] sm:$0xff]  ;;  %3045 = vset.pattern.permute.xlu0 %v3400_v25  ;;  %p1591_p3 = scmp.ge.s32.totalorder %s1592_s17, %s3364_s24 }
 0x43b   : >> { %v2870_v11 = vld [vmem:[%s1597_s30 + $0x18] sm:$0xff]  ;;  %v1612_v29 = vsel %vm1262_vm10, %v2867_v10, 0  ;;  %v1634_v15 = vsel %vm1262_vm10, %v2868_v4, 0  ;;  %v1656_v16 = vsel %vm1262_vm10, %v2869_v23, 0  ;;  %v4113_v52 = vld [vmem:[#allocation4 + $0x28] sm:$0xff] }
 0x43c   : >> { %1621 = vmatpush.bf16.xpose.msra.mxu0 %v1612_v29  ;;  %1643 = vmatpush.bf16.xpose.msra.mxu1 %v1634_v15  ;;  %v1678_v7 = vsel %vm1262_vm10, %v2870_v11, 0  ;;  %v4124_v1 = vld [vmem:[#allocation4 + $0x38] sm:$0xff] }
 0x43d   : >> { %1665 = vmatpush.bf16.xpose.msra.mxu2 %v1656_v16  ;;  %1687 = vmatpush.bf16.xpose.msra.mxu3 %v1678_v7 }
 0x443   : >> { %2792 = vmatmul.msk.bf16.vlgmr.msra.gmra.mxu0 %vm1262_vm10, %v3724_v28  ;;  %2797 = vmatmul.msk.bf16.vlgmr.msra.gmra.mxu1 %vm1262_vm10, %v3726_v35 }
 0x444   : >> { %2802 = vmatmul.msk.bf16.vlgmr.msra.gmra.mxu2 %vm1262_vm10, %v3728_v36  ;;  %2807 = vmatmul.msk.bf16.vlgmr.msra.gmra.mxu3 %vm1262_vm10, %v3730_v39 }
 0x4c0   : >> { %v4067_v17 = vpop.f32.mrf.mxu0  ;;  %v4069_v18 = vpop.f32.mrf.mxu1 }
 0x4c1   : >> { %v1708_v20 = vsel %vm1262_vm10, %v4069_v18, -inf  ;;  %v1702_v6 = vsel %vm1262_vm10, %v4067_v17, -inf }
 0x4c2   : >> { %1709 = vmax.xlane.f32.xlu0 %v1708_v20  ;;  %1703 = vmax.xlane.f32.xlu2 %v1702_v6 }
 0x4c7   : >> { %v4075_v21 = vpop.f32.mrf.mxu2  ;;  %v4077_v32 = vpop.f32.mrf.mxu3 }
 0x4c8   : >> { %v1720_v9 = vsel %vm1262_vm10, %v4077_v32, -inf  ;;  %v4081_v44 = vpop.f32.mrf.mxu0  ;;  %v1714_v14 = vsel %vm1262_vm10, %v4075_v21, -inf  ;;  %v4087_v24 = vpop.f32.mrf.mxu1 }
 0x4c9   : >> { %1721 = vmax.xlane.f32.xlu1 %v1720_v9  ;;  %v1705_v58 = vsel %vm1262_vm10, %v4081_v44, -inf  ;;  %v1711_v43 = vsel %vm1262_vm10, %v4087_v24, -inf }
 0x4ca   : >> { %1715 = vmax.xlane.f32.xlu0 %v1714_v14  ;;  %1706 = vmax.xlane.f32.xlu2 %v1705_v58 }
 0x4cf   : >> { %v4089_v47 = vpop.f32.mrf.mxu2  ;;  %v4095_v63 = vpop.f32.mrf.mxu3 }
 0x4d0   : >> { %v1717_v49 = vsel %vm1262_vm10, %v4089_v47, -inf  ;;  %v1723_v27 = vsel %vm1262_vm10, %v4095_v63, -inf }
 0x4d1   : >> { %1712 = vmax.xlane.f32.xlu1 %v1711_v43  ;;  %v2875_v43 = vld [vmem:[%s1943_s19 + $0x18] sm:$0xff] }
 0x4d2   : >> { %1718 = vmax.xlane.f32.xlu0 %v1717_v49  ;;  %v2874_v49 = vld [vmem:[%s1943_s19 + $0x10] sm:$0xff]  ;;  %2057 = vmatpush.bf16.msrb.mxu3 %v2875_v43 }
 0x4d3   : >> { %2029 = vmatpush.bf16.msrb.mxu2 %v2874_v49 }
 0x4d9   : >> { %1724 = vmax.xlane.f32.xlu1 %v1723_v27 }
 0x535   : >> { %v1710_v33 = vpop.xlane.xlu0 %1709  ;;  %v1704_v8 = vpop.xlane.xlu2 %1703 }
 0x536   : >> { %v1728_v46 = vmax.f32 %v1696_v31, %v1710_v33  ;;  %v1726_v48 = vmax.f32 %v1694_v40, %v1704_v8  ;;  %v2873_v33 = vld [vmem:[%s1943_s19 + $0x8] sm:$0xff]  ;;  %v2872_v8 = vld [vmem:[%s1943_s19] sm:$0xff] }
 0x537   : >> { %2001 = vmatpush.bf16.msrb.mxu1 %v2873_v33  ;;  %1973 = vmatpush.bf16.msrb.mxu0 %v2872_v8 }
 0x538   : >> { %2082 = vst.msk [vmem:[#allocation4 + $0x10] sm:$0xff] %vm1428_vm13, %v1728_v46  ;;  %v1736_v19 = vsub.f32 %v1696_v31, %v1728_v46  ;;  %v1734_v61 = vsub.f32 %v1694_v40, %v1726_v48 }
 0x539   : >> { %2080 = vst.msk [vmem:[#allocation4] sm:$0xff] %vm1428_vm13, %v1726_v48 }
 0x53a   : >> { %v1746_v56 = vmul.f32 1.442695, %v1736_v19  ;;  %v1742_v3 = vmul.f32 1.442695, %v1734_v61 }
 0x53c   : >> { %v1722_v37 = vpop.xlane.xlu1 %1721  ;;  %3047 = vpow2.f32 %v1746_v56 }
 0x53d   : >> { %v4104_v41 = vmax.f32 %v4101_v34, %v1722_v37  ;;  %v1716_v5 = vpop.xlane.xlu0 %1715  ;;  %v1707_v42 = vpop.xlane.xlu2 %1706  ;;  %3049 = vpow2.f32 %v1742_v3 }
 0x53e   : >> { %v1730_v45 = vmax.f32 %v1698_v38, %v1716_v5  ;;  %v1727_v50 = vmax.f32 %v1695_v55, %v1707_v42 }
 0x53f   : >> { %v1740_v12 = vsub.f32 %v4101_v34, %v4104_v41  ;;  %2086 = vst.msk [vmem:[#allocation4 + $0x30] sm:$0xff] %vm1428_vm13, %v4104_v41  ;;  %1790 = vperm.xlu1 %3046, %v4104_v41   ;;  %v1826_v34 = vld [vmem:[#allocation5 + $0x20] sm:$0xff] }
 0x540   : >> { %2084 = vst.msk [vmem:[#allocation4 + $0x20] sm:$0xff] %vm1428_vm13, %v1730_v45  ;;  %1780 = vperm.xlu2 %3044, %v1730_v45   ;;  %v1738_v62 = vsub.f32 %v1698_v38, %v1730_v45  ;;  %v1735_v15 = vsub.f32 %v1695_v55, %v1727_v50 }
 0x541   : >> { %2081 = vst.msk [vmem:[#allocation4 + $0x8] sm:$0xff] %vm1428_vm13, %v1727_v50 }
 0x542   : >> { %v1750_v10 = vmul.f32 1.442695, %v1738_v62  ;;  %v4129_v23 = vpop.eup %3047  ;;  %v1744_v7 = vmul.f32 1.442695, %v1735_v15 }
 0x543   : >> { %v4137_v20 = vpop.eup %3049 }
 0x544   : >> { %v1713_v53 = vpop.xlane.xlu1 %1712  ;;  %3051 = vpow2.f32 %v1750_v10 }
 0x545   : >> { %v1729_v22 = vmax.f32 %v1697_v51, %v1713_v53  ;;  %v1719_v59 = vpop.xlane.xlu0 %1718 }
 0x546   : >> { %v4116_v60 = vmax.f32 %v4113_v52, %v1719_v59 }
 0x547   : >> { %2083 = vst.msk [vmem:[#allocation4 + $0x18] sm:$0xff] %vm1428_vm13, %v1729_v22  ;;  %1765 = vperm.xlu1 %3046, %v1727_v50   ;;  %v1737_v29 = vsub.f32 %v1697_v51, %v1729_v22 }
 0x548   : >> { %v1739_v54 = vsub.f32 %v4113_v52, %v4116_v60  ;;  %2085 = vst.msk [vmem:[#allocation4 + $0x28] sm:$0xff] %vm1428_vm13, %v4116_v60  ;;  %1785 = vperm.xlu0 %3045, %v4116_v60   ;;  %1760 = vperm.xlu2 %3044, %v1726_v48  }
 0x549   : >> { %v1748_v16 = vmul.f32 1.442695, %v1737_v29 }
 0x54a   : >> { %v4139_v6 = vpop.eup %3051 }
 0x54b   : >> { %3053 = vpow2.f32 %v1748_v16 }
 0x54c   : >> { %v1725_v57 = vpop.xlane.xlu1 %1724  ;;  %3055 = vpow2.f32 %v1744_v7 }
 0x54d   : >> { %v4127_v4 = vmax.f32 %v4124_v1, %v1725_v57 }
 0x54f   : >> { %v1741_v11 = vsub.f32 %v4124_v1, %v4127_v4  ;;  %2087 = vst.msk [vmem:[#allocation4 + $0x38] sm:$0xff] %vm1428_vm13, %v4127_v4  ;;  %1775 = vperm.xlu1 %3046, %v1729_v22  }
 0x550   : >> { %1898 = vperm.xlu0 %3045, %v4129_v23   ;;  %1795 = vperm.xlu2 %3044, %v4127_v4   ;;  %v1754_v4 = vmul.f32 1.442695, %v1740_v12  ;;  %v1834_v12 = vmul.f32 %v4139_v6, %v1826_v34 }
 0x551   : >> { %v4143_v9 = vpop.eup %3053 }
 0x552   : >> { %v4145_v14 = vpop.eup %3055 }
 0x557   : >> { %1888 = vperm.xlu1 %3046, %v4137_v20  }
 0x558   : >> { %1908 = vperm.xlu0 %3045, %v4139_v6   ;;  %1770 = vperm.xlu2 %3044, %v1728_v46   ;;  %v1823_v6 = vld [vmem:[#allocation5 + $0x8] sm:$0xff] }
 0x55f   : >> { %1903 = vperm.xlu1 %3046, %v4143_v9  }
 0x560   : >> { %1893 = vperm.xlu2 %3044, %v4145_v14  }
 0x59a   : >> { %v1781_v58 = vpop.permute.xlu2 %1780 }
 0x59b   : >> { %v1802_v31 = vsub.f32 %v4075_v21, %v1781_v58 }
 0x59d   : >> { %v1814_v46 = vmul.f32 1.442695, %v1802_v31 }
 0x5a2   : >> { %v1761_v27 = vpop.permute.xlu2 %1760 }
 0x5a3   : >> { %v1798_v25 = vsub.f32 %v4067_v17, %v1761_v27 }
 0x5a5   : >> { %v1806_v40 = vmul.f32 1.442695, %v1798_v25 }
 0x5a7   : >> { %3057 = vpow2.f32 %v1806_v40 }
 0x5a8   : >> { %3059 = vpow2.f32 %v1814_v46 }
 0x5aa   : >> { %v1796_v48 = vpop.permute.xlu2 %1795 }
 0x5ab   : >> { %v1805_v38 = vsub.f32 %v4095_v63, %v1796_v48 }
 0x5ad   : >> { %v3058_v55 = vpop.eup %3057  ;;  %v1820_v37 = vmul.f32 1.442695, %v1805_v38 }
 0x5ae   : >> { %v1838_v5 = vsel %vm1262_vm10, %v3058_v55, 0.0  ;;  %v3060_v45 = vpop.eup %3059  ;;  %v1934_v49 = vpack.c.bf16 %v3058_v55, %v3058_v55 }
 0x5af   : >> { %1839 = vadd.xlane.f32.xlu0 %v1838_v5  ;;  %3061 = vpow2.f32 %v1820_v37  ;;  %v1850_v53 = vsel %vm1262_vm10, %v3060_v45, 0.0  ;;  %v1938_v31 = vpack.c.bf16 %v3060_v45, %v3060_v45 }
 0x5b0   : >> { %v1954_v38 = vunpack.c.l.b16 %v1934_v49 }
 0x5b1   : >> { %v1791_v42 = vpop.permute.xlu1 %1790  ;;  %v2010_v55 = vunpack.c.l.b16 %v1938_v31  ;;  %v1831_v31 = vmul.f32 %v4145_v14, %v1823_v6 }
 0x5b2   : >> { %v1804_v17 = vsub.f32 %v4077_v32, %v1791_v42  ;;  %v1771_v21 = vpop.permute.xlu2 %1770 }
 0x5b3   : >> { %v1800_v50 = vsub.f32 %v4069_v18, %v1771_v21 }
 0x5b4   : >> { %v1818_v19 = vmul.f32 1.442695, %v1804_v17 }
 0x5b5   : >> { %v1810_v51 = vmul.f32 1.442695, %v1800_v50  ;;  %v3062_v63 = vpop.eup %3061 }
 0x5b6   : >> { %3063 = vpow2.f32 %v1818_v19  ;;  %v1941_v62 = vpack.c.bf16 %v3062_v63, %v3062_v63  ;;  %v1859_v15 = vsel %vm1262_vm10, %v3062_v63, 0.0 }
 0x5b7   : >> { %3065 = vpow2.f32 %v1810_v51  ;;  %1851 = vadd.xlane.f32.xlu0 %v1850_v53 }
 0x5b8   : >> { %v2039_v7 = vunpack.c.l.b16 %v1941_v62  ;;  %v1822_v62 = vld [vmem:[#allocation5] sm:$0xff] }
 0x5b9   : >> { %v1766_v56 = vpop.permute.xlu1 %1765 }
 0x5ba   : >> { %v1799_v22 = vsub.f32 %v4081_v44, %v1766_v56  ;;  %v1786_v59 = vpop.permute.xlu0 %1785  ;;  %v1894_v41 = vpop.permute.xlu2 %1893 }
 0x5bb   : >> { %v1803_v61 = vsub.f32 %v4089_v47, %v1786_v59 }
 0x5bc   : >> { %v3064_v32 = vpop.eup %3063  ;;  %v1808_v3 = vmul.f32 1.442695, %v1799_v22 }
 0x5bd   : >> { %v3066_v57 = vpop.eup %3065  ;;  %v1816_v10 = vmul.f32 1.442695, %v1803_v61  ;;  %v1856_v18 = vsel %vm1262_vm10, %v3064_v32, 0.0  ;;  %v1940_v29 = vpack.c.bf16 %v3064_v32, %v3064_v32 }
 0x5be   : >> { %3067 = vpow2.f32 %v1808_v3  ;;  %1857 = vadd.xlane.f32.xlu2 %v1856_v18  ;;  %v1844_v16 = vsel %vm1262_vm10, %v3066_v57, 0.0  ;;  %v1936_v21 = vpack.c.bf16 %v3066_v57, %v3066_v57  ;;  %v1830_v3 = vmul.f32 %v4137_v20, %v1822_v62  ;;  %v1828_v18 = vld [vmem:[#allocation5 + $0x30] sm:$0xff] }
 0x5bf   : >> { %3069 = vpow2.f32 %v1816_v10  ;;  %1860 = vadd.xlane.f32.xlu0 %v1859_v15  ;;  %1845 = vadd.xlane.f32.xlu1 %v1844_v16  ;;  %v2038_v44 = vunpack.c.l.b16 %v1940_v29  ;;  %v1829_v29 = vld [vmem:[#allocation5 + $0x38] sm:$0xff]  ;;  %v1824_v15 = vld [vmem:[#allocation5 + $0x10] sm:$0xff] }
 0x5c0   : >> { %v1982_v51 = vunpack.c.l.b16 %v1936_v21  ;;  %v1885_v21 = vld [vmem:[#allocation6 + $0x38] sm:$0xff] }
 0x5c1   : >> { %v1776_v47 = vpop.permute.xlu1 %1775  ;;  %v2040_v58 = vpack.c.b16 %v2039_v7, %v2038_v44  ;;  %v1832_v7 = vmul.f32 %v4129_v23, %v1824_v15 }
 0x5c2   : >> { %v1801_v43 = vsub.f32 %v4087_v24, %v1776_v47  ;;  %v1756_v24 = vmul.f32 1.442695, %v1741_v11  ;;  %v1752_v11 = vmul.f32 1.442695, %v1739_v54  ;;  %v1899_v59 = vpop.permute.xlu0 %1898 }
 0x5c3   : >> { %2828 = vmatmul.msk.bf16.vlgmr.msrb.gmra.mxu3 %vm1262_vm10, %v2040_v58 }
 0x5c4   : >> { %v3068_v27 = vpop.eup %3067  ;;  %v1812_v25 = vmul.f32 1.442695, %v1801_v43 }
 0x5c5   : >> { %v3070_v40 = vpop.eup %3069  ;;  %v1841_v33 = vsel %vm1262_vm10, %v3068_v27, 0.0  ;;  %v1935_v8 = vpack.c.bf16 %v3068_v27, %v3068_v27 }
 0x5c6   : >> { %3071 = vpow2.f32 %v1812_v25  ;;  %1842 = vadd.xlane.f32.xlu2 %v1841_v33  ;;  %v1853_v46 = vsel %vm1262_vm10, %v3070_v40, 0.0  ;;  %v1939_v48 = vpack.c.bf16 %v3070_v40, %v3070_v40  ;;  %v1827_v25 = vld [vmem:[#allocation5 + $0x28] sm:$0xff] }
 0x5c7   : >> { %1854 = vadd.xlane.f32.xlu1 %v1853_v46  ;;  %v1955_v37 = vunpack.c.l.b16 %v1935_v8  ;;  %3073 = vpow2.f32 %v1756_v24 }
 0x5c8   : >> { %v2011_v5 = vunpack.c.l.b16 %v1939_v48  ;;  %3075 = vpow2.f32 %v1754_v4  ;;  %v1825_v48 = vld [vmem:[#allocation5 + $0x18] sm:$0xff] }
 0x5c9   : >> { %v1956_v42 = vpack.c.b16 %v1955_v37, %v1954_v38  ;;  %3077 = vpow2.f32 %v1752_v11  ;;  %v1889_v32 = vpop.permute.xlu1 %1888  ;;  %v1833_v38 = vmul.f32 %v4143_v9, %v1825_v48 }
 0x5ca   : >> { %v2012_v17 = vpack.c.b16 %v2011_v5, %v2010_v55  ;;  %v1909_v61 = vpop.permute.xlu0 %1908  ;;  %v1878_v55 = vld [vmem:[#allocation6] sm:$0xff] }
 0x5cb   : >> { %2813 = vmatmul.msk.bf16.vlgmr.msrb.gmra.mxu0 %vm1262_vm10, %v1956_v42  ;;  %v1926_v42 = vmul.f32 %v1889_v32, %v1878_v55  ;;  %v1884_v32 = vld [vmem:[#allocation6 + $0x30] sm:$0xff] }
 0x5cc   : >> { %v3072_v45 = vpop.eup %3071  ;;  %2823 = vmatmul.msk.bf16.vlgmr.msrb.gmra.mxu2 %vm1262_vm10, %v2012_v17 }
 0x5cd   : >> { %v1847_v50 = vsel %vm1262_vm10, %v3072_v45, 0.0  ;;  %v1937_v19 = vpack.c.bf16 %v3072_v45, %v3072_v45  ;;  %v3074_v1 = vpop.eup %3073 }
 0x5ce   : >> { %1848 = vadd.xlane.f32.xlu2 %v1847_v50  ;;  %v3076_v56 = vpop.eup %3075  ;;  %v1837_v20 = vmul.f32 %v3074_v1, %v1829_v29  ;;  %v1882_v50 = vld [vmem:[#allocation6 + $0x20] sm:$0xff] }
 0x5cf   : >> { %v1983_v53 = vunpack.c.l.b16 %v1937_v19  ;;  %v3078_v22 = vpop.eup %3077  ;;  %v1836_v16 = vmul.f32 %v3076_v56, %v1828_v18  ;;  %v1879_v19 = vld [vmem:[#allocation6 + $0x8] sm:$0xff] }
 0x5d0   : >> { %v1835_v33 = vmul.f32 %v3078_v22, %v1827_v25  ;;  %v1927_v9 = vmul.f32 %v1894_v41, %v1879_v19  ;;  %v1881_v41 = vld [vmem:[#allocation6 + $0x18] sm:$0xff] }
 0x5d1   : >> { %v1984_v63 = vpack.c.b16 %v1983_v53, %v1982_v51  ;;  %v4183_v52 = vpop.permute.xlu1 %1903  ;;  %v1880_v51 = vld [vmem:[#allocation6 + $0x10] sm:$0xff] }
 0x5d2   : >> { %v1928_v4 = vmul.f32 %v1899_v59, %v1880_v51  ;;  %v1929_v18 = vmul.f32 %v4183_v52, %v1881_v41 }
 0x5d3   : >> { %2818 = vmatmul.msk.bf16.vlgmr.msrb.gmra.mxu1 %vm1262_vm10, %v1984_v63  ;;  %1923 = vperm.xlu0 %3045, %v3074_v1   ;;  %v1930_v63 = vmul.f32 %v1909_v61, %v1882_v50 }
 0x5e0   : >> { %1918 = vperm.xlu1 %3046, %v3076_v56  }
 0x5e6   : >> { %1913 = vperm.xlu2 %3044, %v3078_v22  }
 0x622   : >> { %v1840_v57 = vpop.xlane.xlu0 %1839 }
 0x623   : >> { %v1862_v10 = vadd.f32 %v1840_v57, %v1830_v3 }
 0x625   : >> { %1870 = vst.msk [vmem:[#allocation5] sm:$0xff] %vm1428_vm13, %v1862_v10 }
 0x62a   : >> { %v1852_v60 = vpop.xlane.xlu0 %1851 }
 0x62b   : >> { %v1866_v54 = vadd.f32 %v1852_v60, %v1834_v12  ;;  %v1883_v12 = vld [vmem:[#allocation6 + $0x28] sm:$0xff] }
 0x62d   : >> { %1874 = vst.msk [vmem:[#allocation5 + $0x20] sm:$0xff] %vm1428_vm13, %v1866_v54 }
 0x631   : >> { %v1858_v44 = vpop.xlane.xlu2 %1857 }
 0x632   : >> { %v1868_v47 = vadd.f32 %v1858_v44, %v1836_v16  ;;  %v1861_v58 = vpop.xlane.xlu0 %1860  ;;  %v1846_v43 = vpop.xlane.xlu1 %1845 }
 0x633   : >> { %v1869_v49 = vadd.f32 %v1861_v58, %v1837_v20  ;;  %v1864_v27 = vadd.f32 %v1846_v43, %v1832_v7 }
 0x634   : >> { %1876 = vst.msk [vmem:[#allocation5 + $0x30] sm:$0xff] %vm1428_vm13, %v1868_v47 }
 0x635   : >> { %1877 = vst.msk [vmem:[#allocation5 + $0x38] sm:$0xff] %vm1428_vm13, %v1869_v49 }
 0x636   : >> { %1872 = vst.msk [vmem:[#allocation5 + $0x10] sm:$0xff] %vm1428_vm13, %v1864_v27 }
 0x639   : >> { %v1843_v40 = vpop.xlane.xlu2 %1842 }
 0x63a   : >> { %v1863_v8 = vadd.f32 %v1843_v40, %v1831_v31  ;;  %v1855_v46 = vpop.xlane.xlu1 %1854 }
 0x63b   : >> { %v1867_v23 = vadd.f32 %v1855_v46, %v1835_v33 }
 0x63c   : >> { %1871 = vst.msk [vmem:[#allocation5 + $0x8] sm:$0xff] %vm1428_vm13, %v1863_v8 }
 0x63d   : >> { %1875 = vst.msk [vmem:[#allocation5 + $0x28] sm:$0xff] %vm1428_vm13, %v1867_v23 }
 0x641   : >> { %v1849_v37 = vpop.xlane.xlu2 %1848 }
 0x642   : >> { %v1865_v24 = vadd.f32 %v1849_v37, %v1833_v38 }
 0x644   : >> { %1873 = vst.msk [vmem:[#allocation5 + $0x18] sm:$0xff] %vm1428_vm13, %v1865_v24 }
 0x645   : >> { %v1924_v45 = vpop.permute.xlu0 %1923 }
 0x646   : >> { %v2059_v5 = vpop.f32.mrf.mxu3  ;;  %v1933_v53 = vmul.f32 %v1924_v45, %v1885_v21 }
 0x648   : >> { %v1975_v14 = vpop.f32.mrf.mxu0 }
 0x649   : >> { %v2064_v17 = vadd.f32 %v1975_v14, %v1926_v42  ;;  %v1914_v60 = vpop.permute.xlu2 %1913 }
 0x64a   : >> { %v1931_v54 = vmul.f32 %v1914_v60, %v1883_v12 }
 0x64b   : >> { %2072 = vst.msk [vmem:[#allocation6] sm:$0xff] %vm1262_vm10, %v2064_v17 }
 0x64e   : >> { %v2061_v1 = vpop.f32.mrf.mxu3 }
 0x64f   : >> { %v2071_v11 = vadd.f32 %v2061_v1, %v1933_v53  ;;  %v2031_v56 = vpop.f32.mrf.mxu2 }
 0x650   : >> { %v1977_v22 = vpop.f32.mrf.mxu0  ;;  %v2003_v62 = vpop.f32.mrf.mxu1  ;;  %v2068_v3 = vadd.f32 %v2031_v56, %v1930_v63 }
 0x651   : >> { %2079 = vst.msk [vmem:[#allocation6 + $0x38] sm:$0xff] %vm1262_vm10, %v2071_v11  ;;  %v2065_v57 = vadd.f32 %v1977_v22, %v1927_v9  ;;  %v2066_v10 = vadd.f32 %v2003_v62, %v1928_v4 }
 0x652   : >> { %2076 = vst.msk [vmem:[#allocation6 + $0x20] sm:$0xff] %vm1262_vm10, %v2068_v3  ;;  %v1919_v34 = vpop.permute.xlu1 %1918 }
 0x653   : >> { %2073 = vst.msk [vmem:[#allocation6 + $0x8] sm:$0xff] %vm1262_vm10, %v2065_v57  ;;  %v1932_v61 = vmul.f32 %v1919_v34, %v1884_v32 }
 0x654   : >> { %2074 = vst.msk [vmem:[#allocation6 + $0x10] sm:$0xff] %vm1262_vm10, %v2066_v10 }
 0x655   : >> { %v2070_v59 = vadd.f32 %v2059_v5, %v1932_v61 }
 0x657   : >> { %2078 = vst.msk [vmem:[#allocation6 + $0x30] sm:$0xff] %vm1262_vm10, %v2070_v59  ;;  %v2033_v29 = vpop.f32.mrf.mxu2  ;;  %1594 = sbr.rel (!%p1591_p3) target bundleno = 1080 (0x438), region = 125 }
 0x658   : >> { %v2005_v15 = vpop.f32.mrf.mxu1  ;;  %v2069_v16 = vadd.f32 %v2033_v29, %v1931_v54 }
 0x659   : >> { %v2067_v44 = vadd.f32 %v2005_v15, %v1929_v18 }
 0x65a   : >> { %2077 = vst.msk [vmem:[#allocation6 + $0x28] sm:$0xff] %vm1262_vm10, %v2069_v16 }
 0x65b   : >> { %2075 = vst.msk [vmem:[#allocation6 + $0x18] sm:$0xff] %vm1262_vm10, %v2067_v44 }
 0x65c PF: > { %v2100_v20 = vld [vmem:[#allocation5 + $0x20] sm:$0xff]  ;;  %v3401_v7 = vmov 0   ;;  %v2101_v47 = vld [vmem:[#allocation5 + $0x28] sm:$0xff]  ;;  %v2102_v58 = vld [vmem:[#allocation5 + $0x30] sm:$0xff]  ;;  %s3402_s12 = smov 48   ;;  %s3403_s20 = smov 32  }
 0x65d   : > { %v2096_v52 = vld [vmem:[#allocation5] sm:$0xff]  ;;  %3080 = vset.pattern.permute.xlu1 %v3401_v7  ;;  %3079 = vset.pattern.permute.xlu0 %v3401_v7  ;;  %3098 = vrcp.f32 %v2100_v20  ;;  %v2097_v43 = vld [vmem:[#allocation5 + $0x8] sm:$0xff]  ;;  %v2103_v6 = vld [vmem:[#allocation5 + $0x38] sm:$0xff]  ;;  %s3404_s6 = smov 16   ;;  %vm2407_vm14 = vcmask 261120   ;;  %vm2410_vm15 = vcmask 392192  }
 0x65e   : > { %3100 = vrcp.f32 %v2096_v52  ;;  %3081 = vset.pattern.permute.xlu2 %v3401_v7  ;;  %v2098_v35 = vld [vmem:[#allocation5 + $0x10] sm:$0xff]  ;;  %v2099_v39 = vld [vmem:[#allocation5 + $0x18] sm:$0xff]  ;;  %v2092_v46 = vld [vmem:[#allocation6 + $0x20] sm:$0xff]  ;;  %s2848_s21 = sshll.u32 %s3364_s24, 1  ;;  %s2849_s2 = sshll.u32 %s3368_s25, 2 }
 0x65f   : > { %3102 = vrcp.f32 %v2101_v47  ;;  %v2088_v38 = vld [vmem:[#allocation6] sm:$0xff]  ;;  %v2094_v50 = vld [vmem:[#allocation6 + $0x30] sm:$0xff]  ;;  %s2532_s3 = sshll.u32 %s4040_s14, 4  ;;  %s4307_s7 = sadd.s32 %s2849_s2, %s2848_s21  ;;  %s2533_s3 = int_to_ptr.vmem [resolvable:$true] %s2532_s3 }
 0x660   : > { %3104 = vrcp.f32 %v2102_v58  ;;  %v2089_v5 = vld [vmem:[#allocation6 + $0x8] sm:$0xff]  ;;  %v2090_v3 = vld [vmem:[#allocation6 + $0x10] sm:$0xff]  ;;  %s2850_s8 = sshll.u32 %s4307_s7, 3  ;;  %s2513_s17 = scalar_lea.sflag [#allocation9], %s3580_s1 }
 0x661   : > { %3106 = vrcp.f32 %v2097_v43  ;;  %v2093_v55 = vld [vmem:[#allocation6 + $0x28] sm:$0xff]  ;;  %v2095_v63 = vld [vmem:[#allocation6 + $0x38] sm:$0xff]  ;;  %s2531_s11 = scalar_lea.hbm %s4385_s5, %s2850_s8 }
 0x662   : > { %3108 = vrcp.f32 %v2103_v6  ;;  %v2091_v57 = vld [vmem:[#allocation6 + $0x18] sm:$0xff]  ;;  %s2534_s18 = sshll.u32 %s2531_s11, 4  ;;  %s2535_s18 = int_to_ptr.hbm [resolvable:$true] %s2534_s18 }
 0x663   : > { %v3099_v49 = vpop.eup %3098  ;;  %3110 = vrcp.f32 %v2098_v35  ;;  %s3252_s15 = sshra.s32 %s2535_s18, 4  ;;  %s3253_s15 = int_to_ptr.hbm [resolvable:$true] %s3252_s15 }
 0x664   : > { %v3101_v27 = vpop.eup %3100  ;;  %2134 = vperm.xlu0 %3079, %v3099_v49   ;;  %3112 = vrcp.f32 %v2099_v39  ;;  %s3254_s30 = scalar_lea.hbm %s3253_s15, 16  ;;  %p3259_p12 = scmp.lt.s32.totalorder %s3253_s15, %s4385_s5 }
 0x665   : > { %2114 = vperm.xlu1 %3080, %v3101_v27   ;;  %v3103_v28 = vpop.eup %3102  ;;  %p3255_p7 = scmp.ne.s32.totalorder %s3253_s15, %s3254_s30 }
 0x666   : > { %v3105_v36 = vpop.eup %3104 }
 0x667   : > { %v3107_v25 = vpop.eup %3106  ;;  %2144 = vperm.xlu2 %3081, %v3105_v36   ;;  %p3256_p10 = pnand %p3255_p7, %p3546_p2 }
 0x668   : > { %v3109_v31 = vpop.eup %3108 }
 0x669   : > { %v3111_v40 = vpop.eup %3110  ;;  %p3257_p11 = pneg %p3256_p10 }
 0x66a   : > { %v3113_v33 = vpop.eup %3112 }
 0x66c   : > { %2139 = vperm.xlu0 %3079, %v3103_v28  }
 0x66d   : > { %2119 = vperm.xlu1 %3080, %v3107_v25  }
 0x66f   : > { %2149 = vperm.xlu2 %3081, %v3109_v31  }
 0x674   : > { %2124 = vperm.xlu0 %3079, %v3111_v40  }
 0x675   : > { %2129 = vperm.xlu1 %3080, %v3113_v33  }
 0x6c1   : > { %v2145_v48 = vpop.permute.xlu2 %2144 }
 0x6c2   : > { %v2158_v11 = vmul.f32 %v2145_v48, %v2094_v50 }
 0x6c4   : > { %v2173_v12 = vrot.slane %v2158_v11, 4 }
 0x6c9   : > { %v2150_v53 = vpop.permute.xlu2 %2149 }
 0x6ca   : > { %v2159_v62 = vmul.f32 %v2150_v53, %v2095_v63 }
 0x6cc   : > { %v2229_v54 = vrot.slane %v2159_v62, 4 }
 0x6d6   : > { %v2135_v8 = vpop.permute.xlu0 %2134 }
 0x6d7   : > { %v2115_v23 = vpop.permute.xlu1 %2114  ;;  %v2156_v37 = vmul.f32 %v2135_v8, %v2092_v46 }
 0x6d8   : > { %v2152_v24 = vmul.f32 %v2115_v23, %v2088_v38 }
 0x6d9   : > { %v2160_v42 = vrot.slane %v2156_v37, 4 }
 0x6da   : > { %v2163_v17 = vrot.slane %v2152_v24, 4 }
 0x6db   : > { %v2162_v1 = vsel %vm536_vm8, %v2160_v42, %v2152_v24 }
 0x6dc   : > { %v2164_v4 = vsel %vm536_vm8, %v2156_v37, %v2163_v17  ;;  %v2168_v32 = vperm.slane %v2162_v1, %v3641_v13 }
 0x6dd   : > { %v2172_v10 = vperm.slane %v2164_v4, %v3641_v13 }
 0x6de   : > { %v2140_v14 = vpop.permute.xlu0 %2139  ;;  %v2187_v29 = vrot.slane %v2168_v32, 4 }
 0x6df   : > { %v2157_v21 = vmul.f32 %v2140_v14, %v2093_v55  ;;  %v2120_v45 = vpop.permute.xlu1 %2119  ;;  %v2199_v44 = vrot.slane %v2172_v10, 4 }
 0x6e0   : > { %v2153_v19 = vmul.f32 %v2120_v45, %v2089_v5 }
 0x6e1   : > { %v2217_v51 = vrot.slane %v2157_v21, 4 }
 0x6e2   : > { %v2219_v9 = vrot.slane %v2153_v19, 4 }
 0x6e3   : > { %v2218_v56 = vsel %vm536_vm8, %v2217_v51, %v2153_v19 }
 0x6e4   : > { %v2220_v22 = vsel %vm536_vm8, %v2157_v21, %v2219_v9  ;;  %v2224_v60 = vperm.slane %v2218_v56, %v3641_v13 }
 0x6e5   : > { %v2228_v61 = vperm.slane %v2220_v22, %v3641_v13 }
 0x6e6   : > { %v2125_v34 = vpop.permute.xlu0 %2124  ;;  %v2243_v47 = vrot.slane %v2224_v60, 4 }
 0x6e7   : > { %v2154_v41 = vmul.f32 %v2125_v34, %v2090_v3  ;;  %v2130_v59 = vpop.permute.xlu1 %2129  ;;  %v2255_v58 = vrot.slane %v2228_v61, 4 }
 0x6e8   : > { %v2155_v18 = vmul.f32 %v2130_v59, %v2091_v57 }
 0x6e9   : > { %v2174_v15 = vsel %vm536_vm8, %v2173_v12, %v2154_v41  ;;  %v2175_v16 = vrot.slane %v2154_v41, 4 }
 0x6ea   : > { %v2180_v20 = vperm.slane %v2174_v15, %v3641_v13  ;;  %v2230_v52 = vsel %vm536_vm8, %v2229_v54, %v2155_v18  ;;  %v2231_v7 = vrot.slane %v2155_v18, 4 }
 0x6eb   : > { %v2176_v43 = vsel %vm536_vm8, %v2158_v11, %v2175_v16  ;;  %v2236_v49 = vperm.slane %v2230_v52, %v3641_v13 }
 0x6ec   : > { %v2184_v27 = vperm.slane %v2176_v43, %v3641_v13  ;;  %v2185_v6 = vrot.slane %v2180_v20, 4  ;;  %v2188_v28 = vsel %vm536_vm8, %v2180_v20, %v2187_v29  ;;  %v2232_v35 = vsel %vm536_vm8, %v2159_v62, %v2231_v7 }
 0x6ed   : > { %v2196_v36 = vperm.slane %v2188_v28, %v3647_v26  ;;  %v2240_v39 = vperm.slane %v2232_v35, %v3641_v13  ;;  %v2241_v25 = vrot.slane %v2236_v49, 4  ;;  %v2244_v31 = vsel %vm536_vm8, %v2236_v49, %v2243_v47 }
 0x6ee   : > { %v2186_v40 = vsel %vm536_vm8, %v2185_v6, %v2168_v32  ;;  %v2197_v33 = vrot.slane %v2184_v27, 4  ;;  %v2200_v8 = vsel %vm536_vm8, %v2184_v27, %v2199_v44  ;;  %v2252_v46 = vperm.slane %v2244_v31, %v3647_v26 }
 0x6ef   : > { %v2192_v23 = vperm.slane %v2186_v40, %v3647_v26  ;;  %v2208_v48 = vperm.slane %v2200_v8, %v3647_v26  ;;  %v2211_v38 = vrot.slane %v2196_v36, 4  ;;  %v2242_v37 = vsel %vm536_vm8, %v2241_v25, %v2224_v60 }
 0x6f0   : > { %v2198_v24 = vsel %vm536_vm8, %v2197_v33, %v2172_v10  ;;  %v2248_v55 = vperm.slane %v2242_v37, %v3647_v26  ;;  %v2253_v5 = vrot.slane %v2240_v39, 4  ;;  %v2256_v42 = vsel %vm536_vm8, %v2240_v39, %v2255_v58 }
 0x6f1   : > { %v2204_v14 = vperm.slane %v2198_v24, %v3647_v26  ;;  %v2209_v17 = vrot.slane %v2192_v23, 4  ;;  %v2212_v21 = vsel %vm536_vm8, 0.0, %v2211_v38  ;;  %v2215_v45 = vrot.slane %v2208_v48, 4 }
 0x6f2   : > { %v2273_v50 = vsel %vm536_vm8, %v2211_v38, %v2192_v23  ;;  %v2278_v19 = vrot.slane %v2212_v21, 4  ;;  %v2254_v51 = vsel %vm536_vm8, %v2253_v5, %v2228_v61  ;;  %v2264_v53 = vperm.slane %v2256_v42, %v3647_v26 }
 0x6f3   : > { %v2210_v63 = vsel %vm536_vm8, 0.0, %v2209_v17  ;;  %v2216_v1 = vsel %vm536_vm8, 0.0, %v2215_v45  ;;  %v2277_v9 = vperm.slane %v2273_v50, %v3641_v13  ;;  %v2284_v4 = vsel %vm536_vm8, %v2215_v45, %v2204_v14 }
 0x6f4   : > { %v2279_v11 = vsel %vm536_vm8, %v2278_v19, %v2210_v63  ;;  %v2288_v56 = vperm.slane %v2284_v4, %v3641_v13  ;;  %v2289_v22 = vrot.slane %v2216_v1, 4  ;;  %v2260_v62 = vperm.slane %v2254_v51, %v3647_v26 }
 0x6f5   : > { %v2283_v3 = vperm.slane %v2279_v11, %v3641_v13  ;;  %v2297_v32 = vrot.slane %v2277_v9, 4  ;;  %v2265_v57 = vrot.slane %v2248_v55, 4  ;;  %v2267_v10 = vrot.slane %v2252_v46, 4 }
 0x6f6   : > { %v2271_v34 = vrot.slane %v2264_v53, 4  ;;  %v2213_v12 = vrot.slane %v2204_v14, 4  ;;  %v2269_v60 = vrot.slane %v2260_v62, 4  ;;  %v2309_v61 = vrot.slane %v2288_v56, 4 }
 0x6f7   : > { %v2266_v41 = vsel %vm536_vm8, 0.0, %v2265_v57  ;;  %v2268_v59 = vsel %vm536_vm8, 0.0, %v2267_v10  ;;  %v2327_v54 = vsel %vm536_vm8, %v2267_v10, %v2248_v55  ;;  %v2298_v18 = vsel %vm536_vm8, %v2283_v3, %v2297_v32 }
 0x6f8   : > { %v2272_v29 = vsel %vm536_vm8, 0.0, %v2271_v34  ;;  %v2331_v15 = vperm.slane %v2327_v54, %v3641_v13  ;;  %v2332_v16 = vrot.slane %v2268_v59, 4  ;;  %v2338_v44 = vsel %vm536_vm8, %v2271_v34, %v2260_v62 }
 0x6f9   : > { %v2342_v20 = vperm.slane %v2338_v44, %v3641_v13  ;;  %v2343_v52 = vrot.slane %v2272_v29, 4  ;;  %v2214_v7 = vsel %vm536_vm8, 0.0, %v2213_v12  ;;  %v2270_v47 = vsel %vm536_vm8, 0.0, %v2269_v60  ;;  %v2879_v60 = vld [vmem:[#allocation13 + $0x18] sm:$0xff] }
 0x6fa   : > { %v2333_v58 = vsel %vm536_vm8, %v2332_v16, %v2266_v41  ;;  %v2351_v43 = vrot.slane %v2331_v15, 4  ;;  %v2290_v49 = vsel %vm536_vm8, %v2289_v22, %v2214_v7  ;;  %v2306_v27 = vperm.slane %v2298_v18, %v3647_v26  ;;  %2453 = vmatpush.bf16.msra.mxu0 %v2879_v60  ;;  %v2876_v41 = vld [vmem:[#allocation13] sm:$0xff] }
 0x6fb   : > { %v2337_v6 = vperm.slane %v2333_v58, %v3641_v13  ;;  %v2294_v28 = vperm.slane %v2290_v49, %v3641_v13  ;;  %v2344_v35 = vsel %vm536_vm8, %v2343_v52, %v2270_v47  ;;  %v2363_v36 = vrot.slane %v2342_v20, 4 }
 0x6fc   : > { %v2325_v39 = vrot.slane %v2306_v27, 4  ;;  %v2348_v25 = vperm.slane %v2344_v35, %v3641_v13  ;;  %v2295_v31 = vrot.slane %v2283_v3, 4 }
 0x6fd   : > { %v2310_v40 = vsel %vm536_vm8, %v2294_v28, %v2309_v61  ;;  %v2352_v33 = vsel %vm536_vm8, %v2337_v6, %v2351_v43  ;;  %v2307_v8 = vrot.slane %v2294_v28, 4  ;;  %v2349_v46 = vrot.slane %v2337_v6, 4  ;;  %v2878_v61 = vld [vmem:[#allocation13 + $0x10] sm:$0xff] }
 0x6fe   : > { %v2318_v23 = vperm.slane %v2310_v40, %v3647_v26  ;;  %v2360_v48 = vperm.slane %v2352_v33, %v3647_v26  ;;  %v2364_v38 = vsel %vm536_vm8, %v2348_v25, %v2363_v36  ;;  %v2296_v37 = vsel %vm536_vm8, %v2295_v31, %v2277_v9  ;;  %2454 = vmatpush.bf16.msra.mxu0 %v2878_v61 }
 0x6ff   : > { %v2372_v24 = vperm.slane %v2364_v38, %v3647_v26  ;;  %v2302_v55 = vperm.slane %v2296_v37, %v3647_v26  ;;  %v2308_v13 = vsel %vm536_vm8, %v2307_v8, %v2288_v56  ;;  %v2350_v5 = vsel %vm536_vm8, %v2349_v46, %v2331_v15 }
 0x700   : > { %v2326_v42 = vsel %vm536_vm8, %v2318_v23, %v2325_v39  ;;  %v2379_v14 = vrot.slane %v2360_v48, 4  ;;  %v2323_v17 = vrot.slane %v2318_v23, 4  ;;  %v2314_v21 = vperm.slane %v2308_v13, %v3647_v26 }
 0x701   : > { %v2377_v45 = vrot.slane %v2372_v24, 4  ;;  %v2321_v50 = vrot.slane %v2302_v55, 4  ;;  %v2356_v19 = vperm.slane %v2350_v5, %v3647_v26  ;;  %v2361_v51 = vrot.slane %v2348_v25, 4 }
 0x702   : > { %v2380_v53 = vsel %vm536_vm8, %v2372_v24, %v2379_v14  ;;  %v2324_v63 = vsel %vm536_vm8, %v2323_v17, %v2306_v27  ;;  %v2319_v1 = vrot.slane %v2314_v21, 4 }
 0x703   : > { %v3092_v9 = vpack.i.bf16 %v2380_v53, %v2326_v42  ;;  %v2378_v4 = vsel %vm536_vm8, %v2377_v45, %v2360_v48  ;;  %v2322_v11 = vsel %vm536_vm8, %v2314_v21, %v2321_v50  ;;  %v2362_v56 = vsel %vm536_vm8, %v2361_v51, %v2342_v20 }
 0x704   : > { %v3087_v22 = vpack.i.bf16 %v2378_v4, %v2324_v63  ;;  %v2368_v62 = vperm.slane %v2362_v56, %v3647_v26  ;;  %v2375_v3 = vrot.slane %v2356_v19, 4  ;;  %v2320_v32 = vsel %vm536_vm8, %v2319_v1, %v2302_v55  ;;  %v2877_v26 = vld [vmem:[#allocation13 + $0x8] sm:$0xff] }
 0x705   : > { %3093 = vrot.lane.b32.xlu1 %v3092_v9, %s3402_s12  ;;  %2455 = vmatpush.bf16.msra.mxu0 %v2877_v26 }
 0x706   : > { %3088 = vrot.lane.b32.xlu0 %v3087_v22, %s3403_s20  ;;  %v2376_v57 = vsel %vm536_vm8, %v2368_v62, %v2375_v3  ;;  %v2373_v10 = vrot.slane %v2368_v62, 4 }
 0x707   : > { %v3082_v34 = vpack.i.bf16 %v2376_v57, %v2322_v11 }
 0x708   : > { %v2374_v12 = vsel %vm536_vm8, %v2373_v10, %v2356_v19 }
 0x709   : > { %3083 = vrot.lane.b32.xlu2 %v3082_v34, %s3404_s6  ;;  %2456 = vmatpush.bf16.msra.mxu0 %v2876_v41 }
 0x763   : > { %v3084_v59 = vpop.permute.xlu2 %3083 }
 0x764   : > { %v3086_v54 = vunpack.i.h.bf16 %v3084_v59  ;;  %v3085_v18 = vunpack.i.l.bf16 %v3084_v59 }
 0x766   : > { %v2406_v20 = vsel %vm1262_vm10, %v2374_v12, %v3086_v54  ;;  %v2405_v52 = vsel %vm1262_vm10, %v2320_v32, %v3085_v18 }
 0x777   : > { %v3094_v29 = vpop.permute.xlu1 %3093 }
 0x778   : > { %v3089_v15 = vpop.permute.xlu0 %3088  ;;  %v3096_v7 = vunpack.i.h.bf16 %v3094_v29  ;;  %v3095_v47 = vunpack.i.l.bf16 %v3094_v29 }
 0x779   : > { %v3091_v16 = vunpack.i.h.bf16 %v3089_v15  ;;  %v3090_v44 = vunpack.i.l.bf16 %v3089_v15 }
 0x77b   : > { %v2408_v58 = vsel %vm2407_vm14, %v2405_v52, %v3090_v44  ;;  %v2409_v43 = vsel %vm2407_vm14, %v2406_v20, %v3091_v16 }
 0x77c   : > { %v2411_v49 = vsel %vm2410_vm15, %v2408_v58, %v3095_v47  ;;  %v2412_v27 = vsel %vm2410_vm15, %v2409_v43, %v3096_v7 }
 0x77d   : > { %v2413_v6 = vpack.c.bf16 %v2412_v27, %v2411_v49 }
 0x77f   : > { %2845 = vmatmul.msk.bf16.vlgmr.msra.gmra.mxu0 %vm360_vm0, %v2413_v6 }
 0x7fc   : > { %v2458_v28 = vpop.f32.mrf.mxu0 }
 0x7fd   : > { %v2463_v35 = vadd.f32 %v2458_v28, %v3598_v0 }
 0x7ff   : > { %2465 = vst.msk [vmem:[%s4040_s14] sm:$0xff] %vm360_vm0, %v2463_v35  ;;  %v2468_v36 = vmul.f32 %v2463_v35, %v2463_v35 }
 0x801   : > { %v2470_v39 = vsel %vm360_vm0, %v2468_v36, 0.0 }
 0x802   : > { %2471 = vadd.xlane.f32.xlu2 %v2470_v39 }
 0x804   : > { %v2460_v25 = vpop.f32.mrf.mxu0 }
 0x805   : > { %v4296_v31 = vadd.f32 %v2460_v25, %v3602_v2 }
 0x807   : > { %2466 = vst.msk [vmem:[%s4040_s14 + $0x8] sm:$0xff] %vm360_vm0, %v4296_v31  ;;  %v2469_v40 = vmul.f32 %v4296_v31, %v4296_v31  ;;  %s3258_s14 = scalar_lea.hbm %s4385_s5, 64 }
 0x808   : > { %p3260_p13 = scmp.lt.s32.totalorder %s3258_s14, %s3254_s30 }
 0x809   : > { %v2473_v33 = vsel %vm360_vm0, %v2469_v40, 0.0 }
 0x80a   : > { %2474 = vadd.xlane.f32.xlu0 %v2473_v33  ;;  %p3261_p0 = por %p3260_p13, %p3259_p12 }
 0x80c   : > { %p3262_p4 = pnand %p3261_p0, %p3257_p11 }
 0x80e   : > { %3265 = shalt.err (!%p3262_p4)
}
 0x80f   : > { %s3405_s20 = smov 128   ;;  %s3406_s6 = smov 8   ;;  %vm2509_vm4 = vcmask 519168  }
 0x810   : > { %2894 = dma.vmem_to_hbm [thread:$0]  (%p3546_p2), %s2533_s3, 256, %s2535_s18, %s2513_s17, %s3405_s20, %s3405_s20, %s3406_s6  }
 0x811   : > { %s4417_s3 = sld [smem:[#allocation28_spill]]  ;;  %s2853_s8 = sshll.u32 %s4307_s7, 2 }
 0x812   : > { %s4418_s11 = sld [smem:[#allocation31_spill]]  ;;  %s2551_s17 = sshll.u32 %s4044_s16, 4  ;;  %s2552_s17 = int_to_ptr.vmem [resolvable:$true] %s2551_s17 }
 0x813   : > { %s2518_s7 = scalar_lea.sflag [#allocation17], %s3580_s1 }
 0x817   : > { %v3097_v17 = vld [vmem:[%s4417_s3] ss:$0 sm:$0xff] }
 0x818   : > { %s2550_s18 = scalar_lea.hbm %s4418_s11, %s2853_s8  ;;  %s3286_s19 = scalar_lea.hbm %s4418_s11, 32 }
 0x819   : > { %s2553_s15 = sshll.u32 %s2550_s18, 4  ;;  %s2554_s15 = int_to_ptr.hbm [resolvable:$true] %s2553_s15 }
 0x81a   : > { %s3280_s30 = sshra.s32 %s2554_s15, 4  ;;  %s3281_s30 = int_to_ptr.hbm [resolvable:$true] %s3280_s30 }
 0x81b   : > { %s3282_s24 = scalar_lea.hbm %s3281_s30, 8  ;;  %p3287_p1 = scmp.lt.s32.totalorder %s3281_s30, %s4418_s11 }
 0x81c   : > { %p3283_p6 = scmp.ne.s32.totalorder %s3281_s30, %s3282_s24  ;;  %p3288_p3 = scmp.lt.s32.totalorder %s3286_s19, %s3282_s24 }
 0x81e   : > { %p3284_p8 = pnand %p3283_p6, %p3546_p2  ;;  %p3289_p7 = por %p3288_p3, %p3287_p1 }
 0x820   : > { %p3285_p9 = pneg %p3284_p8 }
 0x822   : > { %p3290_p10 = pnand %p3289_p7, %p3285_p9 }
 0x875   : > { %v2472_v0 = vpop.xlane.xlu2 %2471 }
 0x876   : > { %v2476_v2 = vmul.f32 %v2472_v0, %v3609_v30 }
 0x878   : > { %v2478_v8 = vadd.f32 1e-05, %v2476_v2 }
 0x87a   : > { %3114 = vrsqrt.f32 %v2478_v8  ;;  %vm2486_vm1 = vweird.f32 %v2478_v8 }
 0x87d   : > { %v2475_v46 = vpop.xlane.xlu0 %2474 }
 0x87e   : > { %v2477_v23 = vmul.f32 %v2475_v46, %v3609_v30 }
 0x880   : > { %v3115_v48 = vpop.eup %3114  ;;  %v2479_v38 = vadd.f32 1e-05, %v2477_v23 }
 0x881   : > { %v2481_v37 = vmul.f32 %v3115_v48, %v2478_v8  ;;  %vm2487_vm0 = vweird.f32 %v3115_v48 }
 0x882   : > { %3116 = vrsqrt.f32 %v2479_v38  ;;  %vm2488_vm2 = vmor %vm2486_vm1, %vm2487_vm0  ;;  %vm2496_vm5 = vweird.f32 %v2479_v38 }
 0x883   : > { %v2482_v24 = vmul.f32 %v3115_v48, %v2481_v37 }
 0x885   : > { %v2483_v55 = vmul.f32 0.5, %v2482_v24 }
 0x887   : > { %v2484_v13 = vsub.f32 1.5, %v2483_v55 }
 0x888   : > { %v3117_v5 = vpop.eup %3116 }
 0x889   : > { %v2485_v42 = vmul.f32 %v3115_v48, %v2484_v13  ;;  %v2491_v14 = vmul.f32 %v3117_v5, %v2479_v38  ;;  %vm2497_vm3 = vweird.f32 %v3117_v5 }
 0x88a   : > { %vm2498_vm6 = vmor %vm2496_vm5, %vm2497_vm3 }
 0x88b   : > { %v2489_v30 = vsel %vm2488_vm2, %v3115_v48, %v2485_v42  ;;  %v2492_v21 = vmul.f32 %v3117_v5, %v2491_v14 }
 0x88c   : > { %v2500_v45 = vmul.f32 %v2489_v30, %v2463_v35 }
 0x88d   : > { %v2493_v50 = vmul.f32 0.5, %v2492_v21 }
 0x88e   : > { %v2505_v19 = vmul.f32 %v3097_v17, %v2500_v45 }
 0x88f   : > { %v2494_v51 = vsub.f32 1.5, %v2493_v50 }
 0x890   : > { %v2507_v53 = vpack.c.bf16 %v2505_v19, %v2505_v19 }
 0x891   : > { %v2495_v63 = vmul.f32 %v3117_v5, %v2494_v51 }
 0x892   : > { %2510 = vst.msk [vmem:[%s4044_s16] sm:$0xf] %vm2509_vm4, %v2507_v53 }
 0x893   : > { %v2499_v1 = vsel %vm2498_vm6, %v3117_v5, %v2495_v63 }
 0x894   : > { %v2501_v9 = vmul.f32 %v2499_v1, %v4296_v31 }
 0x896   : > { %v2506_v4 = vmul.f32 %v3097_v17, %v2501_v9 }
 0x898   : > { %v2508_v11 = vpack.c.bf16 %v2506_v4, %v2506_v4 }
 0x89a   : > { %2511 = vst.msk [vmem:[%s4044_s16 + $0x4] sm:$0xf] %vm2509_vm4, %v2508_v11 }
 0x89b   : > { %3293 = shalt.err (!%p3290_p10)
}
 0x89c   : > { %s3407_s1 = smov 4  }
 0x89d   : > { %2895 = dma.vmem_to_hbm [thread:$0]  (%p3546_p2), %s2552_s17, 128, %s2554_s15, %s2518_s7, %s3397_s13, %s3397_s13, %s3407_s1  }
 0x89e PF: > { %s4419_s16 = sld [smem:[#allocation23_spill]]  ;;  %p2926_p11 = scmp.ge.s32.totalorder %s3380_s28, 2 }
 0x8a0   : > { %p2913_p12 = pnand %p2926_p11, %p3500_p5 }
 0x8a2   : > { %p2914_p13 = pneg %p2913_p12 }
 0x8a4   : > { %s2568_s21 = sand.u32 1, %s4419_s16  }
 0x8a5   : > { %s2569_s2 = scalar_lea.sflag [#allocation9], %s2568_s21 }
 0x8a6   : > { %3343 = dma.done.wait (%p2914_p13), %s2569_s2, 256  }
 0x8a7   : > { %3345 = vsyncadd (%p2914_p13), %s2569_s2, 4294967040  ;;  %s2579_s3 = scalar_lea.sflag [#allocation17], %s2568_s21 }
 0x8a8   : > { %3347 = dma.done.wait (%p2914_p13), %s2579_s3, 128  }
 0x8a9   : > { %3349 = vsyncadd (%p2914_p13), %s2579_s3, 4294967168  ;;  %s28_s28 = sadd.s32 1, %s3380_s28   ;;  %s4421_s29 = sld [smem:[#allocation25_spill]] }
 0x8aa   : > { %p25_p0 = scmp.ge.s32.totalorder %s28_s28, 6   ;;  %s4422_s13 = sld [smem:[#allocation26_spill]] }
 0x8ab   : > { %s4423_s21 = smov %s3356_s22  ;;  %s4424_s22 = smov %s3360_s23 }
 0x8ac   : > { %s4425_s23 = smov %s3565_s4  ;;  %s4426_s24 = smov %s3372_s26 }
 0x8ad   : > { %s4427_s25 = smov %s3376_s27  ;;  %27 = sbr.rel (!%p25_p0) target bundleno = 17 (0x11), region = 136 }
 0x8af   : > { %s4428_s26 = smov %s4421_s29 }
 0x8b0   : > { %s4429_s27 = smov %s4422_s13 }
 0x8b2   :  { %2585 = vsyncpa [#allocation8], 1 }
 0x8b3   :  { %2587 = vsyncpa [#allocation8 + $0x1], 1 }
 0x8b4   :  { %2588 = vsyncpa [#allocation11], 1 }
 0x8b5   :  { %2589 = vsyncpa [#allocation14], 1 }
 0x8b6   :  { %2590 = vsyncpa [#allocation9], 1 }
 0x8b7   :  { %2592 = vsyncpa [#allocation9 + $0x1], 1 }
 0x8b8   :  { %2593 = vsyncpa [#allocation17], 1 }
 0x8b9   :  { %2595 = vsyncpa [#allocation17 + $0x1], 1 }

</bundles_post_ra>
